<compile_context>
chip_gen: v7x
topology: tpu7x:2x2x1
jax: 0.10.0
libtpu: 0.0.40
codegen_flags: <defaults>
</compile_context>

<pallas_src>
import numpy as np
import jax
import jax.numpy as jnp
from jax import lax
from jax.experimental import pallas as pl
from jax.experimental.pallas import tpu as pltpu

# ---------------- small, forward-consistent shapes ----------------
B = 8           # batch of patients (sublane-dim batching; multiple of 8)
H = 32          # patient hidden_dim / patient_dim
D = 32          # mol_dim
AH = 64         # AttentionFusion hidden dim
V = 24          # med vocab size (len(med_voc.word2idx))
T = 3           # number of admissions in the input visit sequence
DIAG_VOC = 40   # diag vocabulary size
PRO_VOC = 30    # procedure vocabulary size
MAXC = 8        # max padded codes per admission (per code type)
VOCP = 72       # padded combined vocab (DIAG_VOC + PRO_VOC -> multiple of 8)
EPS = 1e-5      # nn.LayerNorm default eps

# row offsets inside the packed small-matrix slab (all multiples of 8)
R_WQ, R_WP, R_WA, R_ATC, R_W1P, R_W1A, R_W2 = 0, 64, 96, 128, 152, 184, 216
MAT_ROWS = 224
VEC_ROWS = 16


# ---------------- pallas_call plumbing helpers ----------------
def _full_spec(shape):
    nd = len(shape)
    return pl.BlockSpec(shape, lambda *args, _nd=nd: (0,) * _nd)


def _layernorm(x, g, b):
    mu = jnp.mean(x, axis=-1, keepdims=True)
    var = jnp.mean((x - mu) ** 2, axis=-1, keepdims=True)
    return (x - mu) * lax.rsqrt(var + EPS) * g + b


# ---------------- the single fused kernel ----------------
def fused_forward_kernel(ids_ref, valid_ref, emb_ref, gru_ref, mat_ref, vec_ref,
                         out_ref):
    f32 = jnp.float32
    TB = T * B

    # ---- 1. vectorized per-admission code counts + ONE block-diag embedding matmul ----
    # TODO(synk): nn.Dropout(p=0.5) treated as identity (inference semantics).
    ids = ids_ref[...]                                   # (TB, 2*MAXC) int32
    valid = valid_ref[...]                               # (TB, 2*MAXC) f32 0/1
    lane = lax.broadcasted_iota(jnp.int32, (TB, VOCP), 1)
    cnt = jnp.zeros((TB, VOCP), f32)
    for j in range(2 * MAXC):                            # vectorized VPU compares
        cnt = cnt + jnp.where(lane == ids[:, j:j + 1], valid[:, j:j + 1], 0.0)
    # block-diag table [[diag_emb, 0], [0, pro_emb]] -> x_cat = [diag_sum | pro_sum]
    x_cat = jnp.dot(cnt, emb_ref[...], preferred_element_type=f32)   # (TB, 2H)

    # ---- 2. both GRUs fused: block-diag, gate-grouped (2H, 6H) weights ----
    # column layout: [r_d, r_p, z_d, z_p, n_d, n_p]; hidden layout [h_d, h_p].
    w_in = gru_ref[0:2 * H, :]                           # (2H, 6H)
    w_hh = gru_ref[2 * H:4 * H, :]                       # (2H, 6H)
    b_in = vec_ref[0:1, :]                               # (1, 6H) (r/z biases folded)
    b_hn = vec_ref[1:2, 0:2 * H]                         # (1, 2H)
    gi_all = jnp.dot(x_cat, w_in, preferred_element_type=f32) + b_in  # (TB, 6H)
    h = jnp.zeros((B, 2 * H), f32)
    for t in range(T):                                   # tiny static unroll
        gi = gi_all[t * B:(t + 1) * B, :]                # (B, 6H), time-major rows
        gh = jnp.dot(h, w_hh, preferred_element_type=f32)
        rz = jax.nn.sigmoid(gi[:, :4 * H] + gh[:, :4 * H])   # merged r/z sigmoid
        r = rz[:, :2 * H]
        z = rz[:, 2 * H:]
        n = jnp.tanh(gi[:, 4 * H:] + r * (gh[:, 4 * H:] + b_hn))
        h = (1.0 - z) * n + z * h                        # (B, 2H)

    # ---- 3. get_query(ReLU+Linear) on last step -> patient_projector -> LN ----
    wq = mat_ref[R_WQ:R_WQ + 2 * H, 0:H]
    bq = vec_ref[2:3, 0:H]
    wp = mat_ref[R_WP:R_WP + H, 0:D]
    bp = vec_ref[3:4, 0:D]
    q = jnp.dot(jnp.maximum(h, 0.0), wq, preferred_element_type=f32) + bq   # (B, H)
    p_ = jnp.dot(q, wp, preferred_element_type=f32) + bp                    # (B, D)
    patient = _layernorm(p_, vec_ref[4:5, 0:D], vec_ref[5:6, 0:D])          # (B, D)

    # ---- 4. atc4_projector + LayerNorm ----
    atc4 = mat_ref[R_ATC:R_ATC + V, 0:D]
    wa = mat_ref[R_WA:R_WA + D, 0:D]
    ba = vec_ref[6:7, 0:D]
    a = jnp.dot(atc4, wa, preferred_element_type=f32) + ba                  # (V, D)
    atc4_emb = _layernorm(a, vec_ref[7:8, 0:D], vec_ref[8:9, 0:D])          # (V, D)

    # ---- 5. AttentionFusion + pred LayerNorm, lane-dense (B, V) output ----
    w1p = mat_ref[R_W1P:R_W1P + D, :]                    # (D, AH)
    w1a = mat_ref[R_W1A:R_W1A + D, :]                    # (D, AH)
    b1 = vec_ref[9:10, 0:AH]                             # (1, AH)
    w2 = mat_ref[R_W2:R_W2 + 1, :]                       # (1, AH)
    b2 = vec_ref[10:11, 0:1]                             # (1, 1)
    hp = jnp.dot(patient, w1p, preferred_element_type=f32)    # (B, AH)
    ha = jnp.dot(atc4_emb, w1a, preferred_element_type=f32)   # (V, AH)
    rows = []
    for b in range(B):                                   # per-patient (V, AH) combine
        hc = jnp.tanh(hp[b:b + 1, :] + ha + b1)          # (V, AH)
        s = lax.dot_general(w2, hc, (((1,), (1,)), ((), ())),
                            preferred_element_type=f32) + b2   # (1, V) lane-dense
        rows.append(s)
    scores = jnp.concatenate(rows, axis=0)               # (B, V)
    out_ref[...] = _layernorm(scores, vec_ref[11:12, 0:V], vec_ref[12:13, 0:V])


# ---------------- parameter init (deterministic, PyTorch-style bounds) ----------------
def init_params(key):
    ks = list(jax.random.split(key, 24))
    it = iter(ks)

    def unif(shape, bound):
        return jax.random.uniform(next(it), shape, jnp.float32, -bound, bound)

    p = {}
    p["diag_emb"] = unif((DIAG_VOC, H), 0.1)        # init_weights(): uniform(-0.1, 0.1)
    p["pro_emb"] = unif((PRO_VOC, H), 0.1)
    bH = 1.0 / (H ** 0.5)
    for name in ("gru_diag", "gru_pro"):
        p[name] = dict(
            w_ih=unif((3 * H, H), bH), w_hh=unif((3 * H, H), bH),
            b_ih=unif((3 * H,), bH), b_hh=unif((3 * H,), bH),
        )
    b2H = 1.0 / ((2 * H) ** 0.5)
    p["wq"] = unif((H, 2 * H), b2H); p["bq"] = unif((H,), b2H)          # get_query Linear
    p["wp"] = unif((D, H), bH);      p["bp"] = unif((D,), bH)           # patient_projector
    bD = 1.0 / (D ** 0.5)
    p["wa"] = unif((D, D), bD);      p["ba"] = unif((D,), bD)           # atc4_projector
    p["ln_p_g"] = jnp.ones((D,), jnp.float32); p["ln_p_b"] = jnp.zeros((D,), jnp.float32)
    p["ln_a_g"] = jnp.ones((D,), jnp.float32); p["ln_a_b"] = jnp.zeros((D,), jnp.float32)
    p["ln_pred_g"] = jnp.ones((V,), jnp.float32); p["ln_pred_b"] = jnp.zeros((V,), jnp.float32)
    b2D = 1.0 / ((2 * D) ** 0.5)
    p["attn_w1"] = unif((AH, 2 * D), b2D); p["attn_b1"] = unif((AH,), b2D)
    bA = 1.0 / (AH ** 0.5)
    p["attn_w2"] = unif((1, AH), bA); p["attn_b2"] = unif((1,), bA)
    # atc4_emb_matrix would be built by the MoleculeEncoder (GIN) at init time;
    # it is a learned nn.Parameter, so initialise it deterministically instead.
    p["atc4_matrix"] = jax.random.normal(next(it), (V, D), jnp.float32) * 0.1
    return p


# ---------------- one-time weight preparation: pack everything into 4 slabs ----------------
def prepare_params(p):
    f32 = jnp.float32

    # slab 1: block-diagonal embedding table (VOCP, 2H)
    emb = jnp.zeros((VOCP, 2 * H), f32)
    emb = emb.at[:DIAG_VOC, :H].set(p["diag_emb"])
    emb = emb.at[DIAG_VOC:DIAG_VOC + PRO_VOC, H:].set(p["pro_emb"])

    # slab 2: fused GRU weights (4H, 6H): rows 0:2H = w_in, rows 2H:4H = w_hh
    def blocks(w):  # torch (3H, H), row blocks ordered [r, z, n] -> transposed (H, H)
        return w[0:H].T, w[H:2 * H].T, w[2 * H:3 * H].T

    gd, gp_ = p["gru_diag"], p["gru_pro"]
    ir_d, iz_d, in_d = blocks(gd["w_ih"]); hr_d, hz_d, hn_d = blocks(gd["w_hh"])
    ir_p, iz_p, in_p = blocks(gp_["w_ih"]); hr_p, hz_p, hn_p = blocks(gp_["w_hh"])
    Z = jnp.zeros((H, H), f32)
    w_in = jnp.concatenate([
        jnp.concatenate([ir_d, Z, iz_d, Z, in_d, Z], axis=1),
        jnp.concatenate([Z, ir_p, Z, iz_p, Z, in_p], axis=1)], axis=0)   # (2H, 6H)
    w_hh = jnp.concatenate([
        jnp.concatenate([hr_d, Z, hz_d, Z, hn_d, Z], axis=1),
        jnp.concatenate([Z, hr_p, Z, hz_p, Z, hn_p], axis=1)], axis=0)   # (2H, 6H)
    gru = jnp.concatenate([w_in, w_hh], axis=0)                          # (4H, 6H)

    bi_d, bh_d = gd["b_ih"], gd["b_hh"]
    bi_p, bh_p = gp_["b_ih"], gp_["b_hh"]
    b_in = jnp.concatenate([
        bi_d[0:H] + bh_d[0:H], bi_p[0:H] + bh_p[0:H],                    # r: fold b_ih + b_hh
        bi_d[H:2 * H] + bh_d[H:2 * H], bi_p[H:2 * H] + bh_p[H:2 * H],    # z: fold b_ih + b_hh
        bi_d[2 * H:], bi_p[2 * H:]])                                     # n: input bias only
    b_hn = jnp.concatenate([bh_d[2 * H:], bh_p[2 * H:]])                 # (2H,)

    # slab 3: row-packed small matrices (MAT_ROWS, AH)
    w1 = p["attn_w1"]                                                    # (AH, 2D)
    mat = jnp.zeros((MAT_ROWS, AH), f32)
    mat = mat.at[R_WQ:R_WQ + 2 * H, :H].set(p["wq"].T)
    mat = mat.at[R_WP:R_WP + H, :D].set(p["wp"].T)
    mat = mat.at[R_WA:R_WA + D, :D].set(p["wa"].T)
    mat = mat.at[R_ATC:R_ATC + V, :D].set(p["atc4_matrix"])
    mat = mat.at[R_W1P:R_W1P + D, :AH].set(w1[:, :D].T)
    mat = mat.at[R_W1A:R_W1A + D, :AH].set(w1[:, D:].T)
    mat = mat.at[R_W2:R_W2 + 1, :AH].set(p["attn_w2"])

    # slab 4: bias / LayerNorm vectors (VEC_ROWS, 6H)
    vec = jnp.zeros((VEC_ROWS, 6 * H), f32)
    vec = vec.at[0, :6 * H].set(b_in)
    vec = vec.at[1, :2 * H].set(b_hn)
    vec = vec.at[2, :H].set(p["bq"])
    vec = vec.at[3, :D].set(p["bp"])
    vec = vec.at[4, :D].set(p["ln_p_g"])
    vec = vec.at[5, :D].set(p["ln_p_b"])
    vec = vec.at[6, :D].set(p["ba"])
    vec = vec.at[7, :D].set(p["ln_a_g"])
    vec = vec.at[8, :D].set(p["ln_a_b"])
    vec = vec.at[9, :AH].set(p["attn_b1"])
    vec = vec.at[10, :1].set(p["attn_b2"])
    vec = vec.at[11, :V].set(p["ln_pred_g"])
    vec = vec.at[12, :V].set(p["ln_pred_b"])

    return dict(emb=emb, gru=gru, mat=mat, vec=vec)


# ---------------- forward: a single fused pallas_call over a batch of patients ----------------
def forward(prepared, ids_tb, valid_tb):
    tensors = (prepared["emb"], prepared["gru"], prepared["mat"], prepared["vec"])
    return pl.pallas_call(
        fused_forward_kernel,
        grid=(1,),
        in_specs=[_full_spec(ids_tb.shape), _full_spec(valid_tb.shape)]
                 + [_full_spec(t.shape) for t in tensors],
        out_specs=_full_spec((B, V)),
        out_shape=jax.ShapeDtypeStruct((B, V), jnp.float32),
        compiler_params=pltpu.CompilerParams(dimension_semantics=("arbitrary",)),
    )(ids_tb, valid_tb, *tensors)


forward_jit = jax.jit(forward)


# ---------------- input construction (host-side numpy padding, done once) ----------------
def make_input(key):
    """B patients, each a list of T admissions (diag_code_ids, pro_code_ids)."""
    patients = []
    for b in range(B):
        adms = []
        for t in range(T):
            key, k1, k2 = jax.random.split(key, 3)
            nd = 2 + (b + t) % 4
            npr = 1 + (b + 2 * t) % 4
            diag = np.asarray(jax.random.randint(k1, (nd,), 0, DIAG_VOC), np.int32)
            pro = np.asarray(jax.random.randint(k2, (npr,), 0, PRO_VOC), np.int32)
            adms.append((diag, pro))
        patients.append(adms)
    return patients


def pack_batch(patients):
    """Host (numpy) padding -> time-major (T*B, 2*MAXC) id / validity arrays.
    Pro code ids are offset by DIAG_VOC to index the block-diagonal table."""
    # TODO(synk): admissions with more than MAXC codes per type are truncated.
    ids = np.zeros((T, B, 2 * MAXC), np.int32)
    val = np.zeros((T, B, 2 * MAXC), np.float32)
    for b, adms in enumerate(patients):
        for t, (d, pr) in enumerate(adms):
            d = d[:MAXC]; pr = pr[:MAXC]
            ids[t, b, :d.shape[0]] = d
            val[t, b, :d.shape[0]] = 1.0
            ids[t, b, MAXC:MAXC + pr.shape[0]] = pr + DIAG_VOC
            val[t, b, MAXC:MAXC + pr.shape[0]] = 1.0
    return (jnp.asarray(ids.reshape(T * B, 2 * MAXC)),
            jnp.asarray(val.reshape(T * B, 2 * MAXC)))


if __name__ == "__main__":
    key = jax.random.PRNGKey(0)
    k_params, k_input = jax.random.split(key)
    params = init_params(k_params)
    prepared = prepare_params(params)          # one-time weight packing (not per forward)
    patients = make_input(k_input)
    ids_tb, valid_tb = pack_batch(patients)    # one-time host-side padding

    logits = forward_jit(prepared, ids_tb, valid_tb)
    logits = jax.block_until_ready(logits)
    assert logits.shape == (B, V) and logits.dtype == jnp.float32
    print("KERNEL_OK")
</pallas_src>

<mosaic_0001>
module attributes {stable_mosaic.version = 11 : i64} {
  func.func @fused_forward_kernel(%arg0: i32, %arg1: memref<24x16xi32, #tpu.memory_space<vmem>>, %arg2: memref<24x16xf32, #tpu.memory_space<vmem>>, %arg3: memref<72x64xf32, #tpu.memory_space<vmem>>, %arg4: memref<128x192xf32, #tpu.memory_space<vmem>>, %arg5: memref<224x64xf32, #tpu.memory_space<vmem>>, %arg6: memref<16x192xf32, #tpu.memory_space<vmem>>, %arg7: memref<8x24xf32, #tpu.memory_space<vmem>>) attributes {dimension_semantics = [#tpu.dimension_semantics<arbitrary>], iteration_bounds = array<i64: 1>, scalar_prefetch = 0 : i64, scratch_operands = 0 : i64, tpu.core_type = #tpu.core_type<tc>, window_params = [{pipeline_mode = #tpu.pipeline_mode<synchronous>, transform_indices = @transform_0, window_bounds = array<i64: 24, 16>}, {pipeline_mode = #tpu.pipeline_mode<synchronous>, transform_indices = @transform_1, window_bounds = array<i64: 24, 16>}, {pipeline_mode = #tpu.pipeline_mode<synchronous>, transform_indices = @transform_2, window_bounds = array<i64: 72, 64>}, {pipeline_mode = #tpu.pipeline_mode<synchronous>, transform_indices = @transform_3, window_bounds = array<i64: 128, 192>}, {pipeline_mode = #tpu.pipeline_mode<synchronous>, transform_indices = @transform_4, window_bounds = array<i64: 224, 64>}, {pipeline_mode = #tpu.pipeline_mode<synchronous>, transform_indices = @transform_5, window_bounds = array<i64: 16, 192>}, {pipeline_mode = #tpu.pipeline_mode<synchronous>, transform_indices = @transform_6, window_bounds = array<i64: 8, 24>}]} {
    %c0 = arith.constant 0 : index
    %c0_0 = arith.constant 0 : index
    %0 = vector.load %arg1[%c0, %c0_0] : memref<24x16xi32, #tpu.memory_space<vmem>>, vector<24x16xi32>
    %c0_1 = arith.constant 0 : index
    %c0_2 = arith.constant 0 : index
    %1 = vector.load %arg2[%c0_1, %c0_2] : memref<24x16xf32, #tpu.memory_space<vmem>>, vector<24x16xf32>
    %2 = tpu.iota {dimensions = array<i32: 1>} : vector<24x72xi32>
    %cst = arith.constant 0.000000e+00 : f32
    %3 = vector.broadcast %cst : f32 to vector<24x72xf32>
    %4 = vector.extract_strided_slice %0 {offsets = [0, 0], sizes = [24, 1], strides = [1, 1]} : vector<24x16xi32> to vector<24x1xi32>
    %5 = vector.broadcast %4 : vector<24x1xi32> to vector<24x72xi32>
    %6 = arith.cmpi eq, %2, %5 : vector<24x72xi32>
    %7 = vector.extract_strided_slice %1 {offsets = [0, 0], sizes = [24, 1], strides = [1, 1]} : vector<24x16xf32> to vector<24x1xf32>
    %cst_3 = arith.constant 0.000000e+00 : f32
    %8 = vector.shape_cast %7 : vector<24x1xf32> to vector<24x1xf32>
    %9 = vector.broadcast %8 : vector<24x1xf32> to vector<24x72xf32>
    %10 = vector.broadcast %cst_3 : f32 to vector<24x72xf32>
    %11 = arith.select %6, %9, %10 : vector<24x72xi1>, vector<24x72xf32>
    %12 = arith.addf %3, %11 : vector<24x72xf32>
    %13 = vector.extract_strided_slice %0 {offsets = [0, 1], sizes = [24, 1], strides = [1, 1]} : vector<24x16xi32> to vector<24x1xi32>
    %14 = vector.broadcast %13 : vector<24x1xi32> to vector<24x72xi32>
    %15 = arith.cmpi eq, %2, %14 : vector<24x72xi32>
    %16 = vector.extract_strided_slice %1 {offsets = [0, 1], sizes = [24, 1], strides = [1, 1]} : vector<24x16xf32> to vector<24x1xf32>
    %cst_4 = arith.constant 0.000000e+00 : f32
    %17 = vector.shape_cast %16 : vector<24x1xf32> to vector<24x1xf32>
    %18 = vector.broadcast %17 : vector<24x1xf32> to vector<24x72xf32>
    %19 = vector.broadcast %cst_4 : f32 to vector<24x72xf32>
    %20 = arith.select %15, %18, %19 : vector<24x72xi1>, vector<24x72xf32>
    %21 = arith.addf %12, %20 : vector<24x72xf32>
    %22 = vector.extract_strided_slice %0 {offsets = [0, 2], sizes = [24, 1], strides = [1, 1]} : vector<24x16xi32> to vector<24x1xi32>
    %23 = vector.broadcast %22 : vector<24x1xi32> to vector<24x72xi32>
    %24 = arith.cmpi eq, %2, %23 : vector<24x72xi32>
    %25 = vector.extract_strided_slice %1 {offsets = [0, 2], sizes = [24, 1], strides = [1, 1]} : vector<24x16xf32> to vector<24x1xf32>
    %cst_5 = arith.constant 0.000000e+00 : f32
    %26 = vector.shape_cast %25 : vector<24x1xf32> to vector<24x1xf32>
    %27 = vector.broadcast %26 : vector<24x1xf32> to vector<24x72xf32>
    %28 = vector.broadcast %cst_5 : f32 to vector<24x72xf32>
    %29 = arith.select %24, %27, %28 : vector<24x72xi1>, vector<24x72xf32>
    %30 = arith.addf %21, %29 : vector<24x72xf32>
    %31 = vector.extract_strided_slice %0 {offsets = [0, 3], sizes = [24, 1], strides = [1, 1]} : vector<24x16xi32> to vector<24x1xi32>
    %32 = vector.broadcast %31 : vector<24x1xi32> to vector<24x72xi32>
    %33 = arith.cmpi eq, %2, %32 : vector<24x72xi32>
    %34 = vector.extract_strided_slice %1 {offsets = [0, 3], sizes = [24, 1], strides = [1, 1]} : vector<24x16xf32> to vector<24x1xf32>
    %cst_6 = arith.constant 0.000000e+00 : f32
    %35 = vector.shape_cast %34 : vector<24x1xf32> to vector<24x1xf32>
    %36 = vector.broadcast %35 : vector<24x1xf32> to vector<24x72xf32>
    %37 = vector.broadcast %cst_6 : f32 to vector<24x72xf32>
    %38 = arith.select %33, %36, %37 : vector<24x72xi1>, vector<24x72xf32>
    %39 = arith.addf %30, %38 : vector<24x72xf32>
    %40 = vector.extract_strided_slice %0 {offsets = [0, 4], sizes = [24, 1], strides = [1, 1]} : vector<24x16xi32> to vector<24x1xi32>
    %41 = vector.broadcast %40 : vector<24x1xi32> to vector<24x72xi32>
    %42 = arith.cmpi eq, %2, %41 : vector<24x72xi32>
    %43 = vector.extract_strided_slice %1 {offsets = [0, 4], sizes = [24, 1], strides = [1, 1]} : vector<24x16xf32> to vector<24x1xf32>
    %cst_7 = arith.constant 0.000000e+00 : f32
    %44 = vector.shape_cast %43 : vector<24x1xf32> to vector<24x1xf32>
    %45 = vector.broadcast %44 : vector<24x1xf32> to vector<24x72xf32>
    %46 = vector.broadcast %cst_7 : f32 to vector<24x72xf32>
    %47 = arith.select %42, %45, %46 : vector<24x72xi1>, vector<24x72xf32>
    %48 = arith.addf %39, %47 : vector<24x72xf32>
    %49 = vector.extract_strided_slice %0 {offsets = [0, 5], sizes = [24, 1], strides = [1, 1]} : vector<24x16xi32> to vector<24x1xi32>
    %50 = vector.broadcast %49 : vector<24x1xi32> to vector<24x72xi32>
    %51 = arith.cmpi eq, %2, %50 : vector<24x72xi32>
    %52 = vector.extract_strided_slice %1 {offsets = [0, 5], sizes = [24, 1], strides = [1, 1]} : vector<24x16xf32> to vector<24x1xf32>
    %cst_8 = arith.constant 0.000000e+00 : f32
    %53 = vector.shape_cast %52 : vector<24x1xf32> to vector<24x1xf32>
    %54 = vector.broadcast %53 : vector<24x1xf32> to vector<24x72xf32>
    %55 = vector.broadcast %cst_8 : f32 to vector<24x72xf32>
    %56 = arith.select %51, %54, %55 : vector<24x72xi1>, vector<24x72xf32>
    %57 = arith.addf %48, %56 : vector<24x72xf32>
    %58 = vector.extract_strided_slice %0 {offsets = [0, 6], sizes = [24, 1], strides = [1, 1]} : vector<24x16xi32> to vector<24x1xi32>
    %59 = vector.broadcast %58 : vector<24x1xi32> to vector<24x72xi32>
    %60 = arith.cmpi eq, %2, %59 : vector<24x72xi32>
    %61 = vector.extract_strided_slice %1 {offsets = [0, 6], sizes = [24, 1], strides = [1, 1]} : vector<24x16xf32> to vector<24x1xf32>
    %cst_9 = arith.constant 0.000000e+00 : f32
    %62 = vector.shape_cast %61 : vector<24x1xf32> to vector<24x1xf32>
    %63 = vector.broadcast %62 : vector<24x1xf32> to vector<24x72xf32>
    %64 = vector.broadcast %cst_9 : f32 to vector<24x72xf32>
    %65 = arith.select %60, %63, %64 : vector<24x72xi1>, vector<24x72xf32>
    %66 = arith.addf %57, %65 : vector<24x72xf32>
    %67 = vector.extract_strided_slice %0 {offsets = [0, 7], sizes = [24, 1], strides = [1, 1]} : vector<24x16xi32> to vector<24x1xi32>
    %68 = vector.broadcast %67 : vector<24x1xi32> to vector<24x72xi32>
    %69 = arith.cmpi eq, %2, %68 : vector<24x72xi32>
    %70 = vector.extract_strided_slice %1 {offsets = [0, 7], sizes = [24, 1], strides = [1, 1]} : vector<24x16xf32> to vector<24x1xf32>
    %cst_10 = arith.constant 0.000000e+00 : f32
    %71 = vector.shape_cast %70 : vector<24x1xf32> to vector<24x1xf32>
    %72 = vector.broadcast %71 : vector<24x1xf32> to vector<24x72xf32>
    %73 = vector.broadcast %cst_10 : f32 to vector<24x72xf32>
    %74 = arith.select %69, %72, %73 : vector<24x72xi1>, vector<24x72xf32>
    %75 = arith.addf %66, %74 : vector<24x72xf32>
    %76 = vector.extract_strided_slice %0 {offsets = [0, 8], sizes = [24, 1], strides = [1, 1]} : vector<24x16xi32> to vector<24x1xi32>
    %77 = vector.broadcast %76 : vector<24x1xi32> to vector<24x72xi32>
    %78 = arith.cmpi eq, %2, %77 : vector<24x72xi32>
    %79 = vector.extract_strided_slice %1 {offsets = [0, 8], sizes = [24, 1], strides = [1, 1]} : vector<24x16xf32> to vector<24x1xf32>
    %cst_11 = arith.constant 0.000000e+00 : f32
    %80 = vector.shape_cast %79 : vector<24x1xf32> to vector<24x1xf32>
    %81 = vector.broadcast %80 : vector<24x1xf32> to vector<24x72xf32>
    %82 = vector.broadcast %cst_11 : f32 to vector<24x72xf32>
    %83 = arith.select %78, %81, %82 : vector<24x72xi1>, vector<24x72xf32>
    %84 = arith.addf %75, %83 : vector<24x72xf32>
    %85 = vector.extract_strided_slice %0 {offsets = [0, 9], sizes = [24, 1], strides = [1, 1]} : vector<24x16xi32> to vector<24x1xi32>
    %86 = vector.broadcast %85 : vector<24x1xi32> to vector<24x72xi32>
    %87 = arith.cmpi eq, %2, %86 : vector<24x72xi32>
    %88 = vector.extract_strided_slice %1 {offsets = [0, 9], sizes = [24, 1], strides = [1, 1]} : vector<24x16xf32> to vector<24x1xf32>
    %cst_12 = arith.constant 0.000000e+00 : f32
    %89 = vector.shape_cast %88 : vector<24x1xf32> to vector<24x1xf32>
    %90 = vector.broadcast %89 : vector<24x1xf32> to vector<24x72xf32>
    %91 = vector.broadcast %cst_12 : f32 to vector<24x72xf32>
    %92 = arith.select %87, %90, %91 : vector<24x72xi1>, vector<24x72xf32>
    %93 = arith.addf %84, %92 : vector<24x72xf32>
    %94 = vector.extract_strided_slice %0 {offsets = [0, 10], sizes = [24, 1], strides = [1, 1]} : vector<24x16xi32> to vector<24x1xi32>
    %95 = vector.broadcast %94 : vector<24x1xi32> to vector<24x72xi32>
    %96 = arith.cmpi eq, %2, %95 : vector<24x72xi32>
    %97 = vector.extract_strided_slice %1 {offsets = [0, 10], sizes = [24, 1], strides = [1, 1]} : vector<24x16xf32> to vector<24x1xf32>
    %cst_13 = arith.constant 0.000000e+00 : f32
    %98 = vector.shape_cast %97 : vector<24x1xf32> to vector<24x1xf32>
    %99 = vector.broadcast %98 : vector<24x1xf32> to vector<24x72xf32>
    %100 = vector.broadcast %cst_13 : f32 to vector<24x72xf32>
    %101 = arith.select %96, %99, %100 : vector<24x72xi1>, vector<24x72xf32>
    %102 = arith.addf %93, %101 : vector<24x72xf32>
    %103 = vector.extract_strided_slice %0 {offsets = [0, 11], sizes = [24, 1], strides = [1, 1]} : vector<24x16xi32> to vector<24x1xi32>
    %104 = vector.broadcast %103 : vector<24x1xi32> to vector<24x72xi32>
    %105 = arith.cmpi eq, %2, %104 : vector<24x72xi32>
    %106 = vector.extract_strided_slice %1 {offsets = [0, 11], sizes = [24, 1], strides = [1, 1]} : vector<24x16xf32> to vector<24x1xf32>
    %cst_14 = arith.constant 0.000000e+00 : f32
    %107 = vector.shape_cast %106 : vector<24x1xf32> to vector<24x1xf32>
    %108 = vector.broadcast %107 : vector<24x1xf32> to vector<24x72xf32>
    %109 = vector.broadcast %cst_14 : f32 to vector<24x72xf32>
    %110 = arith.select %105, %108, %109 : vector<24x72xi1>, vector<24x72xf32>
    %111 = arith.addf %102, %110 : vector<24x72xf32>
    %112 = vector.extract_strided_slice %0 {offsets = [0, 12], sizes = [24, 1], strides = [1, 1]} : vector<24x16xi32> to vector<24x1xi32>
    %113 = vector.broadcast %112 : vector<24x1xi32> to vector<24x72xi32>
    %114 = arith.cmpi eq, %2, %113 : vector<24x72xi32>
    %115 = vector.extract_strided_slice %1 {offsets = [0, 12], sizes = [24, 1], strides = [1, 1]} : vector<24x16xf32> to vector<24x1xf32>
    %cst_15 = arith.constant 0.000000e+00 : f32
    %116 = vector.shape_cast %115 : vector<24x1xf32> to vector<24x1xf32>
    %117 = vector.broadcast %116 : vector<24x1xf32> to vector<24x72xf32>
    %118 = vector.broadcast %cst_15 : f32 to vector<24x72xf32>
    %119 = arith.select %114, %117, %118 : vector<24x72xi1>, vector<24x72xf32>
    %120 = arith.addf %111, %119 : vector<24x72xf32>
    %121 = vector.extract_strided_slice %0 {offsets = [0, 13], sizes = [24, 1], strides = [1, 1]} : vector<24x16xi32> to vector<24x1xi32>
    %122 = vector.broadcast %121 : vector<24x1xi32> to vector<24x72xi32>
    %123 = arith.cmpi eq, %2, %122 : vector<24x72xi32>
    %124 = vector.extract_strided_slice %1 {offsets = [0, 13], sizes = [24, 1], strides = [1, 1]} : vector<24x16xf32> to vector<24x1xf32>
    %cst_16 = arith.constant 0.000000e+00 : f32
    %125 = vector.shape_cast %124 : vector<24x1xf32> to vector<24x1xf32>
    %126 = vector.broadcast %125 : vector<24x1xf32> to vector<24x72xf32>
    %127 = vector.broadcast %cst_16 : f32 to vector<24x72xf32>
    %128 = arith.select %123, %126, %127 : vector<24x72xi1>, vector<24x72xf32>
    %129 = arith.addf %120, %128 : vector<24x72xf32>
    %130 = vector.extract_strided_slice %0 {offsets = [0, 14], sizes = [24, 1], strides = [1, 1]} : vector<24x16xi32> to vector<24x1xi32>
    %131 = vector.broadcast %130 : vector<24x1xi32> to vector<24x72xi32>
    %132 = arith.cmpi eq, %2, %131 : vector<24x72xi32>
    %133 = vector.extract_strided_slice %1 {offsets = [0, 14], sizes = [24, 1], strides = [1, 1]} : vector<24x16xf32> to vector<24x1xf32>
    %cst_17 = arith.constant 0.000000e+00 : f32
    %134 = vector.shape_cast %133 : vector<24x1xf32> to vector<24x1xf32>
    %135 = vector.broadcast %134 : vector<24x1xf32> to vector<24x72xf32>
    %136 = vector.broadcast %cst_17 : f32 to vector<24x72xf32>
    %137 = arith.select %132, %135, %136 : vector<24x72xi1>, vector<24x72xf32>
    %138 = arith.addf %129, %137 : vector<24x72xf32>
    %139 = vector.extract_strided_slice %0 {offsets = [0, 15], sizes = [24, 1], strides = [1, 1]} : vector<24x16xi32> to vector<24x1xi32>
    %140 = vector.broadcast %139 : vector<24x1xi32> to vector<24x72xi32>
    %141 = arith.cmpi eq, %2, %140 : vector<24x72xi32>
    %142 = vector.extract_strided_slice %1 {offsets = [0, 15], sizes = [24, 1], strides = [1, 1]} : vector<24x16xf32> to vector<24x1xf32>
    %cst_18 = arith.constant 0.000000e+00 : f32
    %143 = vector.shape_cast %142 : vector<24x1xf32> to vector<24x1xf32>
    %144 = vector.broadcast %143 : vector<24x1xf32> to vector<24x72xf32>
    %145 = vector.broadcast %cst_18 : f32 to vector<24x72xf32>
    %146 = arith.select %141, %144, %145 : vector<24x72xi1>, vector<24x72xf32>
    %147 = arith.addf %138, %146 : vector<24x72xf32>
    %c0_19 = arith.constant 0 : index
    %c0_20 = arith.constant 0 : index
    %148 = vector.load %arg3[%c0_19, %c0_20] : memref<72x64xf32, #tpu.memory_space<vmem>>, vector<72x64xf32>
    %cst_21 = arith.constant dense<0.000000e+00> : vector<24x64xf32>
    %149 = tpu.matmul %147, %148, %cst_21 {dimension_numbers = #tpu.dot_dimension_numbers<[1], [0], [0], [1], [0, 0, 1, 1], [], []>} : vector<24x72xf32>, vector<72x64xf32>, vector<24x64xf32> -> vector<24x64xf32>
    %c0_22 = arith.constant 0 : index
    %c0_23 = arith.constant 0 : index
    %150 = vector.load %arg4[%c0_22, %c0_23] : memref<128x192xf32, #tpu.memory_space<vmem>>, vector<64x192xf32>
    %c64 = arith.constant 64 : index
    %c0_24 = arith.constant 0 : index
    %151 = vector.load %arg4[%c64, %c0_24] : memref<128x192xf32, #tpu.memory_space<vmem>>, vector<64x192xf32>
    %c0_25 = arith.constant 0 : index
    %c0_26 = arith.constant 0 : index
    %152 = vector.load %arg6[%c0_25, %c0_26] : memref<16x192xf32, #tpu.memory_space<vmem>>, vector<1x192xf32>
    %c1 = arith.constant 1 : index
    %c0_27 = arith.constant 0 : index
    %153 = vector.load %arg6[%c1, %c0_27] : memref<16x192xf32, #tpu.memory_space<vmem>>, vector<1x64xf32>
    %cst_28 = arith.constant dense<0.000000e+00> : vector<24x192xf32>
    %154 = tpu.matmul %149, %150, %cst_28 {dimension_numbers = #tpu.dot_dimension_numbers<[1], [0], [0], [1], [0, 0, 1, 1], [], []>} : vector<24x64xf32>, vector<64x192xf32>, vector<24x192xf32> -> vector<24x192xf32>
    %155 = vector.broadcast %152 : vector<1x192xf32> to vector<24x192xf32>
    %156 = arith.addf %154, %155 : vector<24x192xf32>
    %cst_29 = arith.constant 0.000000e+00 : f32
    %157 = vector.broadcast %cst_29 : f32 to vector<8x64xf32>
    %158 = vector.extract_strided_slice %156 {offsets = [0, 0], sizes = [8, 192], strides = [1, 1]} : vector<24x192xf32> to vector<8x192xf32>
    %cst_30 = arith.constant dense<0.000000e+00> : vector<8x192xf32>
    %159 = tpu.matmul %157, %151, %cst_30 {dimension_numbers = #tpu.dot_dimension_numbers<[1], [0], [0], [1], [0, 0, 1, 1], [], []>} : vector<8x64xf32>, vector<64x192xf32>, vector<8x192xf32> -> vector<8x192xf32>
    %160 = vector.extract_strided_slice %158 {offsets = [0, 0], sizes = [8, 128], strides = [1, 1]} : vector<8x192xf32> to vector<8x128xf32>
    %161 = vector.extract_strided_slice %159 {offsets = [0, 0], sizes = [8, 128], strides = [1, 1]} : vector<8x192xf32> to vector<8x128xf32>
    %162 = arith.addf %160, %161 : vector<8x128xf32>
    %163 = arith.negf %162 : vector<8x128xf32>
    %164 = math.exp %163 : vector<8x128xf32>
    %cst_31 = arith.constant 1.000000e+00 : f32
    %165 = vector.broadcast %cst_31 : f32 to vector<8x128xf32>
    %166 = arith.addf %165, %164 : vector<8x128xf32>
    %167 = arith.divf %165, %166 : vector<8x128xf32>
    %168 = vector.extract_strided_slice %167 {offsets = [0, 0], sizes = [8, 64], strides = [1, 1]} : vector<8x128xf32> to vector<8x64xf32>
    %169 = vector.extract_strided_slice %167 {offsets = [0, 64], sizes = [8, 64], strides = [1, 1]} : vector<8x128xf32> to vector<8x64xf32>
    %170 = vector.extract_strided_slice %158 {offsets = [0, 128], sizes = [8, 64], strides = [1, 1]} : vector<8x192xf32> to vector<8x64xf32>
    %171 = vector.extract_strided_slice %159 {offsets = [0, 128], sizes = [8, 64], strides = [1, 1]} : vector<8x192xf32> to vector<8x64xf32>
    %172 = vector.broadcast %153 : vector<1x64xf32> to vector<8x64xf32>
    %173 = arith.addf %171, %172 : vector<8x64xf32>
    %174 = arith.mulf %168, %173 : vector<8x64xf32>
    %175 = arith.addf %170, %174 : vector<8x64xf32>
    %176 = math.tanh %175 : vector<8x64xf32>
    %cst_32 = arith.constant 1.000000e+00 : f32
    %177 = vector.broadcast %cst_32 : f32 to vector<8x64xf32>
    %178 = arith.subf %177, %169 : vector<8x64xf32>
    %179 = arith.mulf %178, %176 : vector<8x64xf32>
    %180 = arith.mulf %169, %157 : vector<8x64xf32>
    %181 = arith.addf %179, %180 : vector<8x64xf32>
    %182 = vector.extract_strided_slice %156 {offsets = [8, 0], sizes = [8, 192], strides = [1, 1]} : vector<24x192xf32> to vector<8x192xf32>
    %cst_33 = arith.constant dense<0.000000e+00> : vector<8x192xf32>
    %183 = tpu.matmul %181, %151, %cst_33 {dimension_numbers = #tpu.dot_dimension_numbers<[1], [0], [0], [1], [0, 0, 1, 1], [], []>} : vector<8x64xf32>, vector<64x192xf32>, vector<8x192xf32> -> vector<8x192xf32>
    %184 = vector.extract_strided_slice %182 {offsets = [0, 0], sizes = [8, 128], strides = [1, 1]} : vector<8x192xf32> to vector<8x128xf32>
    %185 = vector.extract_strided_slice %183 {offsets = [0, 0], sizes = [8, 128], strides = [1, 1]} : vector<8x192xf32> to vector<8x128xf32>
    %186 = arith.addf %184, %185 : vector<8x128xf32>
    %187 = arith.negf %186 : vector<8x128xf32>
    %188 = math.exp %187 : vector<8x128xf32>
    %cst_34 = arith.constant 1.000000e+00 : f32
    %189 = vector.broadcast %cst_34 : f32 to vector<8x128xf32>
    %190 = arith.addf %189, %188 : vector<8x128xf32>
    %191 = arith.divf %189, %190 : vector<8x128xf32>
    %192 = vector.extract_strided_slice %191 {offsets = [0, 0], sizes = [8, 64], strides = [1, 1]} : vector<8x128xf32> to vector<8x64xf32>
    %193 = vector.extract_strided_slice %191 {offsets = [0, 64], sizes = [8, 64], strides = [1, 1]} : vector<8x128xf32> to vector<8x64xf32>
    %194 = vector.extract_strided_slice %182 {offsets = [0, 128], sizes = [8, 64], strides = [1, 1]} : vector<8x192xf32> to vector<8x64xf32>
    %195 = vector.extract_strided_slice %183 {offsets = [0, 128], sizes = [8, 64], strides = [1, 1]} : vector<8x192xf32> to vector<8x64xf32>
    %196 = vector.broadcast %153 : vector<1x64xf32> to vector<8x64xf32>
    %197 = arith.addf %195, %196 : vector<8x64xf32>
    %198 = arith.mulf %192, %197 : vector<8x64xf32>
    %199 = arith.addf %194, %198 : vector<8x64xf32>
    %200 = math.tanh %199 : vector<8x64xf32>
    %cst_35 = arith.constant 1.000000e+00 : f32
    %201 = vector.broadcast %cst_35 : f32 to vector<8x64xf32>
    %202 = arith.subf %201, %193 : vector<8x64xf32>
    %203 = arith.mulf %202, %200 : vector<8x64xf32>
    %204 = arith.mulf %193, %181 : vector<8x64xf32>
    %205 = arith.addf %203, %204 : vector<8x64xf32>
    %206 = vector.extract_strided_slice %156 {offsets = [16, 0], sizes = [8, 192], strides = [1, 1]} : vector<24x192xf32> to vector<8x192xf32>
    %cst_36 = arith.constant dense<0.000000e+00> : vector<8x192xf32>
    %207 = tpu.matmul %205, %151, %cst_36 {dimension_numbers = #tpu.dot_dimension_numbers<[1], [0], [0], [1], [0, 0, 1, 1], [], []>} : vector<8x64xf32>, vector<64x192xf32>, vector<8x192xf32> -> vector<8x192xf32>
    %208 = vector.extract_strided_slice %206 {offsets = [0, 0], sizes = [8, 128], strides = [1, 1]} : vector<8x192xf32> to vector<8x128xf32>
    %209 = vector.extract_strided_slice %207 {offsets = [0, 0], sizes = [8, 128], strides = [1, 1]} : vector<8x192xf32> to vector<8x128xf32>
    %210 = arith.addf %208, %209 : vector<8x128xf32>
    %211 = arith.negf %210 : vector<8x128xf32>
    %212 = math.exp %211 : vector<8x128xf32>
    %cst_37 = arith.constant 1.000000e+00 : f32
    %213 = vector.broadcast %cst_37 : f32 to vector<8x128xf32>
    %214 = arith.addf %213, %212 : vector<8x128xf32>
    %215 = arith.divf %213, %214 : vector<8x128xf32>
    %216 = vector.extract_strided_slice %215 {offsets = [0, 0], sizes = [8, 64], strides = [1, 1]} : vector<8x128xf32> to vector<8x64xf32>
    %217 = vector.extract_strided_slice %215 {offsets = [0, 64], sizes = [8, 64], strides = [1, 1]} : vector<8x128xf32> to vector<8x64xf32>
    %218 = vector.extract_strided_slice %206 {offsets = [0, 128], sizes = [8, 64], strides = [1, 1]} : vector<8x192xf32> to vector<8x64xf32>
    %219 = vector.extract_strided_slice %207 {offsets = [0, 128], sizes = [8, 64], strides = [1, 1]} : vector<8x192xf32> to vector<8x64xf32>
    %220 = vector.broadcast %153 : vector<1x64xf32> to vector<8x64xf32>
    %221 = arith.addf %219, %220 : vector<8x64xf32>
    %222 = arith.mulf %216, %221 : vector<8x64xf32>
    %223 = arith.addf %218, %222 : vector<8x64xf32>
    %224 = math.tanh %223 : vector<8x64xf32>
    %cst_38 = arith.constant 1.000000e+00 : f32
    %225 = vector.broadcast %cst_38 : f32 to vector<8x64xf32>
    %226 = arith.subf %225, %217 : vector<8x64xf32>
    %227 = arith.mulf %226, %224 : vector<8x64xf32>
    %228 = arith.mulf %217, %205 : vector<8x64xf32>
    %229 = arith.addf %227, %228 : vector<8x64xf32>
    %c0_39 = arith.constant 0 : index
    %c0_40 = arith.constant 0 : index
    %230 = vector.load %arg5[%c0_39, %c0_40] : memref<224x64xf32, #tpu.memory_space<vmem>>, vector<64x32xf32>
    %c2 = arith.constant 2 : index
    %c0_41 = arith.constant 0 : index
    %231 = vector.load %arg6[%c2, %c0_41] : memref<16x192xf32, #tpu.memory_space<vmem>>, vector<1x32xf32>
    %c64_42 = arith.constant 64 : index
    %c0_43 = arith.constant 0 : index
    %232 = vector.load %arg5[%c64_42, %c0_43] : memref<224x64xf32, #tpu.memory_space<vmem>>, vector<32x32xf32>
    %c3 = arith.constant 3 : index
    %c0_44 = arith.constant 0 : index
    %233 = vector.load %arg6[%c3, %c0_44] : memref<16x192xf32, #tpu.memory_space<vmem>>, vector<1x32xf32>
    %cst_45 = arith.constant 0.000000e+00 : f32
    %234 = vector.broadcast %cst_45 : f32 to vector<8x64xf32>
    %235 = arith.maximumf %229, %234 : vector<8x64xf32>
    %cst_46 = arith.constant dense<0.000000e+00> : vector<8x32xf32>
    %236 = tpu.matmul %235, %230, %cst_46 {dimension_numbers = #tpu.dot_dimension_numbers<[1], [0], [0], [1], [0, 0, 1, 1], [], []>} : vector<8x64xf32>, vector<64x32xf32>, vector<8x32xf32> -> vector<8x32xf32>
    %237 = vector.broadcast %231 : vector<1x32xf32> to vector<8x32xf32>
    %238 = arith.addf %236, %237 : vector<8x32xf32>
    %cst_47 = arith.constant dense<0.000000e+00> : vector<8x32xf32>
    %239 = tpu.matmul %238, %232, %cst_47 {dimension_numbers = #tpu.dot_dimension_numbers<[1], [0], [0], [1], [0, 0, 1, 1], [], []>} : vector<8x32xf32>, vector<32x32xf32>, vector<8x32xf32> -> vector<8x32xf32>
    %240 = vector.broadcast %233 : vector<1x32xf32> to vector<8x32xf32>
    %241 = arith.addf %239, %240 : vector<8x32xf32>
    %c4 = arith.constant 4 : index
    %c0_48 = arith.constant 0 : index
    %242 = vector.load %arg6[%c4, %c0_48] : memref<16x192xf32, #tpu.memory_space<vmem>>, vector<1x32xf32>
    %c5 = arith.constant 5 : index
    %c0_49 = arith.constant 0 : index
    %243 = vector.load %arg6[%c5, %c0_49] : memref<16x192xf32, #tpu.memory_space<vmem>>, vector<1x32xf32>
    %cst_50 = arith.constant dense<0.000000e+00> : vector<8xf32>
    %244 = vector.multi_reduction <add>, %241, %cst_50 [1] : vector<8x32xf32> to vector<8xf32>
    %245 = vector.shape_cast %244 : vector<8xf32> to vector<8x1xf32>
    %cst_51 = arith.constant 3.200000e+01 : f32
    %246 = vector.broadcast %cst_51 : f32 to vector<8x1xf32>
    %247 = arith.divf %245, %246 : vector<8x1xf32>
    %248 = vector.broadcast %247 : vector<8x1xf32> to vector<8x32xf32>
    %249 = arith.subf %241, %248 : vector<8x32xf32>
    %250 = arith.mulf %249, %249 : vector<8x32xf32>
    %cst_52 = arith.constant dense<0.000000e+00> : vector<8xf32>
    %251 = vector.multi_reduction <add>, %250, %cst_52 [1] : vector<8x32xf32> to vector<8xf32>
    %252 = vector.shape_cast %251 : vector<8xf32> to vector<8x1xf32>
    %cst_53 = arith.constant 3.200000e+01 : f32
    %253 = vector.broadcast %cst_53 : f32 to vector<8x1xf32>
    %254 = arith.divf %252, %253 : vector<8x1xf32>
    %255 = vector.broadcast %247 : vector<8x1xf32> to vector<8x32xf32>
    %256 = arith.subf %241, %255 : vector<8x32xf32>
    %cst_54 = arith.constant 9.99999974E-6 : f32
    %257 = vector.broadcast %cst_54 : f32 to vector<8x1xf32>
    %258 = arith.addf %254, %257 : vector<8x1xf32>
    %259 = math.rsqrt %258 : vector<8x1xf32>
    %260 = vector.broadcast %259 : vector<8x1xf32> to vector<8x32xf32>
    %261 = arith.mulf %256, %260 : vector<8x32xf32>
    %262 = vector.broadcast %242 : vector<1x32xf32> to vector<8x32xf32>
    %263 = arith.mulf %261, %262 : vector<8x32xf32>
    %264 = vector.broadcast %243 : vector<1x32xf32> to vector<8x32xf32>
    %265 = arith.addf %263, %264 : vector<8x32xf32>
    %c128 = arith.constant 128 : index
    %c0_55 = arith.constant 0 : index
    %266 = vector.load %arg5[%c128, %c0_55] : memref<224x64xf32, #tpu.memory_space<vmem>>, vector<24x32xf32>
    %c96 = arith.constant 96 : index
    %c0_56 = arith.constant 0 : index
    %267 = vector.load %arg5[%c96, %c0_56] : memref<224x64xf32, #tpu.memory_space<vmem>>, vector<32x32xf32>
    %c6 = arith.constant 6 : index
    %c0_57 = arith.constant 0 : index
    %268 = vector.load %arg6[%c6, %c0_57] : memref<16x192xf32, #tpu.memory_space<vmem>>, vector<1x32xf32>
    %cst_58 = arith.constant dense<0.000000e+00> : vector<24x32xf32>
    %269 = tpu.matmul %266, %267, %cst_58 {dimension_numbers = #tpu.dot_dimension_numbers<[1], [0], [0], [1], [0, 0, 1, 1], [], []>} : vector<24x32xf32>, vector<32x32xf32>, vector<24x32xf32> -> vector<24x32xf32>
    %270 = vector.broadcast %268 : vector<1x32xf32> to vector<24x32xf32>
    %271 = arith.addf %269, %270 : vector<24x32xf32>
    %c7 = arith.constant 7 : index
    %c0_59 = arith.constant 0 : index
    %272 = vector.load %arg6[%c7, %c0_59] : memref<16x192xf32, #tpu.memory_space<vmem>>, vector<1x32xf32>
    %c8 = arith.constant 8 : index
    %c0_60 = arith.constant 0 : index
    %273 = vector.load %arg6[%c8, %c0_60] : memref<16x192xf32, #tpu.memory_space<vmem>>, vector<1x32xf32>
    %cst_61 = arith.constant dense<0.000000e+00> : vector<24xf32>
    %274 = vector.multi_reduction <add>, %271, %cst_61 [1] : vector<24x32xf32> to vector<24xf32>
    %275 = vector.shape_cast %274 : vector<24xf32> to vector<24x1xf32>
    %cst_62 = arith.constant 3.200000e+01 : f32
    %276 = vector.broadcast %cst_62 : f32 to vector<24x1xf32>
    %277 = arith.divf %275, %276 : vector<24x1xf32>
    %278 = vector.broadcast %277 : vector<24x1xf32> to vector<24x32xf32>
    %279 = arith.subf %271, %278 : vector<24x32xf32>
    %280 = arith.mulf %279, %279 : vector<24x32xf32>
    %cst_63 = arith.constant dense<0.000000e+00> : vector<24xf32>
    %281 = vector.multi_reduction <add>, %280, %cst_63 [1] : vector<24x32xf32> to vector<24xf32>
    %282 = vector.shape_cast %281 : vector<24xf32> to vector<24x1xf32>
    %cst_64 = arith.constant 3.200000e+01 : f32
    %283 = vector.broadcast %cst_64 : f32 to vector<24x1xf32>
    %284 = arith.divf %282, %283 : vector<24x1xf32>
    %285 = vector.broadcast %277 : vector<24x1xf32> to vector<24x32xf32>
    %286 = arith.subf %271, %285 : vector<24x32xf32>
    %cst_65 = arith.constant 9.99999974E-6 : f32
    %287 = vector.broadcast %cst_65 : f32 to vector<24x1xf32>
    %288 = arith.addf %284, %287 : vector<24x1xf32>
    %289 = math.rsqrt %288 : vector<24x1xf32>
    %290 = vector.broadcast %289 : vector<24x1xf32> to vector<24x32xf32>
    %291 = arith.mulf %286, %290 : vector<24x32xf32>
    %292 = vector.broadcast %272 : vector<1x32xf32> to vector<24x32xf32>
    %293 = arith.mulf %291, %292 : vector<24x32xf32>
    %294 = vector.broadcast %273 : vector<1x32xf32> to vector<24x32xf32>
    %295 = arith.addf %293, %294 : vector<24x32xf32>
    %c152 = arith.constant 152 : index
    %c0_66 = arith.constant 0 : index
    %296 = vector.load %arg5[%c152, %c0_66] : memref<224x64xf32, #tpu.memory_space<vmem>>, vector<32x64xf32>
    %c184 = arith.constant 184 : index
    %c0_67 = arith.constant 0 : index
    %297 = vector.load %arg5[%c184, %c0_67] : memref<224x64xf32, #tpu.memory_space<vmem>>, vector<32x64xf32>
    %c9 = arith.constant 9 : index
    %c0_68 = arith.constant 0 : index
    %298 = vector.load %arg6[%c9, %c0_68] : memref<16x192xf32, #tpu.memory_space<vmem>>, vector<1x64xf32>
    %c216 = arith.constant 216 : index
    %c0_69 = arith.constant 0 : index
    %299 = vector.load %arg5[%c216, %c0_69] : memref<224x64xf32, #tpu.memory_space<vmem>>, vector<1x64xf32>
    %c10 = arith.constant 10 : index
    %c0_70 = arith.constant 0 : index
    %300 = vector.load %arg6[%c10, %c0_70] : memref<16x192xf32, #tpu.memory_space<vmem>>, vector<1x1xf32>
    %cst_71 = arith.constant dense<0.000000e+00> : vector<8x64xf32>
    %301 = tpu.matmul %265, %296, %cst_71 {dimension_numbers = #tpu.dot_dimension_numbers<[1], [0], [0], [1], [0, 0, 1, 1], [], []>} : vector<8x32xf32>, vector<32x64xf32>, vector<8x64xf32> -> vector<8x64xf32>
    %cst_72 = arith.constant dense<0.000000e+00> : vector<24x64xf32>
    %302 = tpu.matmul %295, %297, %cst_72 {dimension_numbers = #tpu.dot_dimension_numbers<[1], [0], [0], [1], [0, 0, 1, 1], [], []>} : vector<24x32xf32>, vector<32x64xf32>, vector<24x64xf32> -> vector<24x64xf32>
    %303 = vector.extract_strided_slice %301 {offsets = [0, 0], sizes = [1, 64], strides = [1, 1]} : vector<8x64xf32> to vector<1x64xf32>
    %304 = vector.broadcast %303 : vector<1x64xf32> to vector<24x64xf32>
    %305 = arith.addf %304, %302 : vector<24x64xf32>
    %306 = vector.broadcast %298 : vector<1x64xf32> to vector<24x64xf32>
    %307 = arith.addf %305, %306 : vector<24x64xf32>
    %308 = math.tanh %307 : vector<24x64xf32>
    %cst_73 = arith.constant dense<0.000000e+00> : vector<1x24xf32>
    %309 = tpu.matmul %299, %308, %cst_73 {dimension_numbers = #tpu.dot_dimension_numbers<[1], [1], [0], [0], [0, 0, 1, 0], [], []>} : vector<1x64xf32>, vector<24x64xf32>, vector<1x24xf32> -> vector<1x24xf32>
    %310 = vector.broadcast %300 : vector<1x1xf32> to vector<1x24xf32>
    %311 = arith.addf %309, %310 : vector<1x24xf32>
    %312 = vector.extract_strided_slice %301 {offsets = [1, 0], sizes = [1, 64], strides = [1, 1]} : vector<8x64xf32> to vector<1x64xf32>
    %313 = vector.broadcast %312 : vector<1x64xf32> to vector<24x64xf32>
    %314 = arith.addf %313, %302 : vector<24x64xf32>
    %315 = vector.broadcast %298 : vector<1x64xf32> to vector<24x64xf32>
    %316 = arith.addf %314, %315 : vector<24x64xf32>
    %317 = math.tanh %316 : vector<24x64xf32>
    %cst_74 = arith.constant dense<0.000000e+00> : vector<1x24xf32>
    %318 = tpu.matmul %299, %317, %cst_74 {dimension_numbers = #tpu.dot_dimension_numbers<[1], [1], [0], [0], [0, 0, 1, 0], [], []>} : vector<1x64xf32>, vector<24x64xf32>, vector<1x24xf32> -> vector<1x24xf32>
    %319 = vector.broadcast %300 : vector<1x1xf32> to vector<1x24xf32>
    %320 = arith.addf %318, %319 : vector<1x24xf32>
    %321 = vector.extract_strided_slice %301 {offsets = [2, 0], sizes = [1, 64], strides = [1, 1]} : vector<8x64xf32> to vector<1x64xf32>
    %322 = vector.broadcast %321 : vector<1x64xf32> to vector<24x64xf32>
    %323 = arith.addf %322, %302 : vector<24x64xf32>
    %324 = vector.broadcast %298 : vector<1x64xf32> to vector<24x64xf32>
    %325 = arith.addf %323, %324 : vector<24x64xf32>
    %326 = math.tanh %325 : vector<24x64xf32>
    %cst_75 = arith.constant dense<0.000000e+00> : vector<1x24xf32>
    %327 = tpu.matmul %299, %326, %cst_75 {dimension_numbers = #tpu.dot_dimension_numbers<[1], [1], [0], [0], [0, 0, 1, 0], [], []>} : vector<1x64xf32>, vector<24x64xf32>, vector<1x24xf32> -> vector<1x24xf32>
    %328 = vector.broadcast %300 : vector<1x1xf32> to vector<1x24xf32>
    %329 = arith.addf %327, %328 : vector<1x24xf32>
    %330 = vector.extract_strided_slice %301 {offsets = [3, 0], sizes = [1, 64], strides = [1, 1]} : vector<8x64xf32> to vector<1x64xf32>
    %331 = vector.broadcast %330 : vector<1x64xf32> to vector<24x64xf32>
    %332 = arith.addf %331, %302 : vector<24x64xf32>
    %333 = vector.broadcast %298 : vector<1x64xf32> to vector<24x64xf32>
    %334 = arith.addf %332, %333 : vector<24x64xf32>
    %335 = math.tanh %334 : vector<24x64xf32>
    %cst_76 = arith.constant dense<0.000000e+00> : vector<1x24xf32>
    %336 = tpu.matmul %299, %335, %cst_76 {dimension_numbers = #tpu.dot_dimension_numbers<[1], [1], [0], [0], [0, 0, 1, 0], [], []>} : vector<1x64xf32>, vector<24x64xf32>, vector<1x24xf32> -> vector<1x24xf32>
    %337 = vector.broadcast %300 : vector<1x1xf32> to vector<1x24xf32>
    %338 = arith.addf %336, %337 : vector<1x24xf32>
    %339 = vector.extract_strided_slice %301 {offsets = [4, 0], sizes = [1, 64], strides = [1, 1]} : vector<8x64xf32> to vector<1x64xf32>
    %340 = vector.broadcast %339 : vector<1x64xf32> to vector<24x64xf32>
    %341 = arith.addf %340, %302 : vector<24x64xf32>
    %342 = vector.broadcast %298 : vector<1x64xf32> to vector<24x64xf32>
    %343 = arith.addf %341, %342 : vector<24x64xf32>
    %344 = math.tanh %343 : vector<24x64xf32>
    %cst_77 = arith.constant dense<0.000000e+00> : vector<1x24xf32>
    %345 = tpu.matmul %299, %344, %cst_77 {dimension_numbers = #tpu.dot_dimension_numbers<[1], [1], [0], [0], [0, 0, 1, 0], [], []>} : vector<1x64xf32>, vector<24x64xf32>, vector<1x24xf32> -> vector<1x24xf32>
    %346 = vector.broadcast %300 : vector<1x1xf32> to vector<1x24xf32>
    %347 = arith.addf %345, %346 : vector<1x24xf32>
    %348 = vector.extract_strided_slice %301 {offsets = [5, 0], sizes = [1, 64], strides = [1, 1]} : vector<8x64xf32> to vector<1x64xf32>
    %349 = vector.broadcast %348 : vector<1x64xf32> to vector<24x64xf32>
    %350 = arith.addf %349, %302 : vector<24x64xf32>
    %351 = vector.broadcast %298 : vector<1x64xf32> to vector<24x64xf32>
    %352 = arith.addf %350, %351 : vector<24x64xf32>
    %353 = math.tanh %352 : vector<24x64xf32>
    %cst_78 = arith.constant dense<0.000000e+00> : vector<1x24xf32>
    %354 = tpu.matmul %299, %353, %cst_78 {dimension_numbers = #tpu.dot_dimension_numbers<[1], [1], [0], [0], [0, 0, 1, 0], [], []>} : vector<1x64xf32>, vector<24x64xf32>, vector<1x24xf32> -> vector<1x24xf32>
    %355 = vector.broadcast %300 : vector<1x1xf32> to vector<1x24xf32>
    %356 = arith.addf %354, %355 : vector<1x24xf32>
    %357 = vector.extract_strided_slice %301 {offsets = [6, 0], sizes = [1, 64], strides = [1, 1]} : vector<8x64xf32> to vector<1x64xf32>
    %358 = vector.broadcast %357 : vector<1x64xf32> to vector<24x64xf32>
    %359 = arith.addf %358, %302 : vector<24x64xf32>
    %360 = vector.broadcast %298 : vector<1x64xf32> to vector<24x64xf32>
    %361 = arith.addf %359, %360 : vector<24x64xf32>
    %362 = math.tanh %361 : vector<24x64xf32>
    %cst_79 = arith.constant dense<0.000000e+00> : vector<1x24xf32>
    %363 = tpu.matmul %299, %362, %cst_79 {dimension_numbers = #tpu.dot_dimension_numbers<[1], [1], [0], [0], [0, 0, 1, 0], [], []>} : vector<1x64xf32>, vector<24x64xf32>, vector<1x24xf32> -> vector<1x24xf32>
    %364 = vector.broadcast %300 : vector<1x1xf32> to vector<1x24xf32>
    %365 = arith.addf %363, %364 : vector<1x24xf32>
    %366 = vector.extract_strided_slice %301 {offsets = [7, 0], sizes = [1, 64], strides = [1, 1]} : vector<8x64xf32> to vector<1x64xf32>
    %367 = vector.broadcast %366 : vector<1x64xf32> to vector<24x64xf32>
    %368 = arith.addf %367, %302 : vector<24x64xf32>
    %369 = vector.broadcast %298 : vector<1x64xf32> to vector<24x64xf32>
    %370 = arith.addf %368, %369 : vector<24x64xf32>
    %371 = math.tanh %370 : vector<24x64xf32>
    %cst_80 = arith.constant dense<0.000000e+00> : vector<1x24xf32>
    %372 = tpu.matmul %299, %371, %cst_80 {dimension_numbers = #tpu.dot_dimension_numbers<[1], [1], [0], [0], [0, 0, 1, 0], [], []>} : vector<1x64xf32>, vector<24x64xf32>, vector<1x24xf32> -> vector<1x24xf32>
    %373 = vector.broadcast %300 : vector<1x1xf32> to vector<1x24xf32>
    %374 = arith.addf %372, %373 : vector<1x24xf32>
    %375 = tpu.concatenate %311, %320, %329, %338, %347, %356, %365, %374 in 0 : vector<1x24xf32>, vector<1x24xf32>, vector<1x24xf32>, vector<1x24xf32>, vector<1x24xf32>, vector<1x24xf32>, vector<1x24xf32>, vector<1x24xf32> -> vector<8x24xf32>
    %c11 = arith.constant 11 : index
    %c0_81 = arith.constant 0 : index
    %376 = vector.load %arg6[%c11, %c0_81] : memref<16x192xf32, #tpu.memory_space<vmem>>, vector<1x24xf32>
    %c12 = arith.constant 12 : index
    %c0_82 = arith.constant 0 : index
    %377 = vector.load %arg6[%c12, %c0_82] : memref<16x192xf32, #tpu.memory_space<vmem>>, vector<1x24xf32>
    %cst_83 = arith.constant dense<0.000000e+00> : vector<8xf32>
    %378 = vector.multi_reduction <add>, %375, %cst_83 [1] : vector<8x24xf32> to vector<8xf32>
    %379 = vector.shape_cast %378 : vector<8xf32> to vector<8x1xf32>
    %cst_84 = arith.constant 2.400000e+01 : f32
    %380 = vector.broadcast %cst_84 : f32 to vector<8x1xf32>
    %381 = arith.divf %379, %380 : vector<8x1xf32>
    %382 = vector.broadcast %381 : vector<8x1xf32> to vector<8x24xf32>
    %383 = arith.subf %375, %382 : vector<8x24xf32>
    %384 = arith.mulf %383, %383 : vector<8x24xf32>
    %cst_85 = arith.constant dense<0.000000e+00> : vector<8xf32>
    %385 = vector.multi_reduction <add>, %384, %cst_85 [1] : vector<8x24xf32> to vector<8xf32>
    %386 = vector.shape_cast %385 : vector<8xf32> to vector<8x1xf32>
    %cst_86 = arith.constant 2.400000e+01 : f32
    %387 = vector.broadcast %cst_86 : f32 to vector<8x1xf32>
    %388 = arith.divf %386, %387 : vector<8x1xf32>
    %389 = vector.broadcast %381 : vector<8x1xf32> to vector<8x24xf32>
    %390 = arith.subf %375, %389 : vector<8x24xf32>
    %cst_87 = arith.constant 9.99999974E-6 : f32
    %391 = vector.broadcast %cst_87 : f32 to vector<8x1xf32>
    %392 = arith.addf %388, %391 : vector<8x1xf32>
    %393 = math.rsqrt %392 : vector<8x1xf32>
    %394 = vector.broadcast %393 : vector<8x1xf32> to vector<8x24xf32>
    %395 = arith.mulf %390, %394 : vector<8x24xf32>
    %396 = vector.broadcast %376 : vector<1x24xf32> to vector<8x24xf32>
    %397 = arith.mulf %395, %396 : vector<8x24xf32>
    %398 = vector.broadcast %377 : vector<1x24xf32> to vector<8x24xf32>
    %399 = arith.addf %397, %398 : vector<8x24xf32>
    %c0_88 = arith.constant 0 : index
    %c0_89 = arith.constant 0 : index
    %400 = vector.load %arg7[%c0_88, %c0_89] : memref<8x24xf32, #tpu.memory_space<vmem>>, vector<8x24xf32>
    tpu.vector_store %arg7[%c0_88, %c0_89], %399 {strides = array<i32>} : memref<8x24xf32, #tpu.memory_space<vmem>>, vector<8x24xf32>,
    return
  }
  func.func @transform_0(%arg0: i32) -> (i32, i32) {
    %c0_i32 = arith.constant 0 : i32
    %c0_i32_0 = arith.constant 0 : i32
    %c0_i32_1 = arith.constant 0 : i32
    return %c0_i32, %c0_i32_0 : i32, i32
  }
  func.func @transform_1(%arg0: i32) -> (i32, i32) {
    %c0_i32 = arith.constant 0 : i32
    %c0_i32_0 = arith.constant 0 : i32
    %c0_i32_1 = arith.constant 0 : i32
    return %c0_i32, %c0_i32_0 : i32, i32
  }
  func.func @transform_2(%arg0: i32) -> (i32, i32) {
    %c0_i32 = arith.constant 0 : i32
    %c0_i32_0 = arith.constant 0 : i32
    %c0_i32_1 = arith.constant 0 : i32
    return %c0_i32, %c0_i32_0 : i32, i32
  }
  func.func @transform_3(%arg0: i32) -> (i32, i32) {
    %c0_i32 = arith.constant 0 : i32
    %c0_i32_0 = arith.constant 0 : i32
    %c0_i32_1 = arith.constant 0 : i32
    return %c0_i32, %c0_i32_0 : i32, i32
  }
  func.func @transform_4(%arg0: i32) -> (i32, i32) {
    %c0_i32 = arith.constant 0 : i32
    %c0_i32_0 = arith.constant 0 : i32
    %c0_i32_1 = arith.constant 0 : i32
    return %c0_i32, %c0_i32_0 : i32, i32
  }
  func.func @transform_5(%arg0: i32) -> (i32, i32) {
    %c0_i32 = arith.constant 0 : i32
    %c0_i32_0 = arith.constant 0 : i32
    %c0_i32_1 = arith.constant 0 : i32
    return %c0_i32, %c0_i32_0 : i32, i32
  }
  func.func @transform_6(%arg0: i32) -> (i32, i32) {
    %c0_i32 = arith.constant 0 : i32
    %c0_i32_0 = arith.constant 0 : i32
    %c0_i32_1 = arith.constant 0 : i32
    return %c0_i32, %c0_i32_0 : i32, i32
  }
}

</mosaic_0001>

<bundles_post_ra>
// kernel: forward.1
= control target key start
LH: loop header
LB: loop body
LE: loop exit
PB: predicated region body
PF: predicated region fallthrough
CT: control target
= control target key end

     0   :  { %v2988_v1 = vmov 2   ;;  %v2989_v2 = vmov 0   ;;  %s3822_s0 = inlined_call_operand.vmem [shape: s32[24,16], index: 0, kind: input, shape index: {}]   ;;  %s3823_s1 = inlined_call_operand.vmem [shape: f32[24,16], index: 1, kind: input, shape index: {}]   ;;  %s3824_s2 = inlined_call_operand.vmem [shape: f32[72,64], index: 2, kind: input, shape index: {}]   ;;  %s3825_s3 = inlined_call_operand.vmem [shape: f32[128,192], index: 3, kind: input, shape index: {}]   ;;  %s3826_s4 = inlined_call_operand.vmem [shape: f32[224,64], index: 4, kind: input, shape index: {}]   ;;  %s3827_s5 = inlined_call_operand.vmem [shape: f32[16,192], index: 5, kind: input, shape index: {}]   ;;  %s3828_s6 = inlined_call_operand.hbm [shape: f32[8,24], index: 6, kind: output, shape index: {}]  }
   0x1   :  { %v3047_v0 = vld [vmem:[%s3823_s1] sm:$0xff]  ;;  %2818 = vset.pattern.permute.xlu0 %v2988_v1  ;;  %2815 = vset.pattern.permute.xlu1 %v2989_v2 }
   0x2   :  { %108 = vperm.xlu0 %2818, %v3047_v0   ;;  %46 = vperm.xlu1 %2815, %v3047_v0  }
   0x3   :  { %11 = vsyncpa [#allocation3], 0  ;;  %v3056_v3 = vld [vmem:[%s3822_s0] sm:$0xff]  ;;  %v2990_v4 = vmov 1   ;;  %v3063_v5 = vld [vmem:[%s3823_s1 + $0x8] sm:$0xff]  ;;  %v2991_v6 = vmov 5   ;;  %v30_v25 = vlaneseq }
   0x4   :  { %v2992_v7 = vmov 3   ;;  %v3077_v8 = vld [vmem:[%s3822_s0 + $0x10] sm:$0xff]  ;;  %v3082_v9 = vld [vmem:[%s3822_s0 + $0x8] sm:$0xff]  ;;  %v2993_v10 = vmov 4   ;;  %v2994_v12 = vmov 6   ;;  %v2995_v13 = vmov 7  }
   0x5   :  { %v3105_v11 = vld [vmem:[%s3823_s1 + $0x10] sm:$0xff]  ;;  %v2996_v14 = vmov 10   ;;  %v2997_v15 = vmov 9   ;;  %v2998_v16 = vmov 8   ;;  %v2999_v17 = vmov 15   ;;  %s3007_s11 = smov 64  }
   0x6   :  { %2819 = vset.pattern.permute.xlu0 %v2990_v4  ;;  %2816 = vset.pattern.permute.xlu1 %v2990_v4  ;;  %v3000_v18 = vmov 12   ;;  %v3001_v23 = vmov 11   ;;  %v3002_v27 = vmov 14   ;;  %v3168_v28 = vand.u32 127, %v30_v25  ;;  %s3008_s7 = smov [#allocation2]  }
   0x7   :  { %78 = vperm.xlu1 %2816, %v3047_v0   ;;  %66 = vperm.xlu0 %2819, %v3056_v3   ;;  %v3003_v31 = vmov 13   ;;  %s2339_s1 = sshll.u32 %s3008_s7, 4  ;;  %s2340_s1 = int_to_ptr.vmem [resolvable:$true] %s2339_s1 }
   0x8   :  { %p2969_p1 = scmp.lt.s32.totalorder %s2340_s1, %s2340_s1 }
   0xb   :  { %2817 = vset.pattern.permute.xlu1 %v2988_v1  ;;  %82 = vperm.xlu0 %2819, %v3063_v5  }
   0xc   :  { %96 = vperm.xlu1 %2817, %v3056_v3  }
   0xf   :  { %2826 = vset.pattern.permute.xlu0 %v2991_v6 }
  0x10   :  { %198 = vperm.xlu0 %2826, %v3047_v0   ;;  %2820 = vset.pattern.permute.xlu1 %v2992_v7 }
  0x11   :  { %126 = vperm.xlu1 %2820, %v3056_v3  }
  0x14   :  { %2827 = vset.pattern.permute.xlu0 %v2989_v2 }
  0x15   :  { %33 = vperm.xlu0 %2827, %v3056_v3   ;;  %138 = vperm.xlu1 %2820, %v3047_v0  }
  0x19   :  { %39 = vperm.xlu0 %2827, %v3077_v8   ;;  %2821 = vset.pattern.permute.xlu1 %v2989_v2 }
  0x1a   :  { %36 = vperm.xlu1 %2821, %v3082_v9  }
  0x1d   :  { %2829 = vset.pattern.permute.xlu0 %v2993_v10 }
  0x1e   :  { %156 = vperm.xlu0 %2829, %v3056_v3   ;;  %2822 = vset.pattern.permute.xlu1 %v2990_v4 }
  0x1f   :  { %69 = vperm.xlu1 %2822, %v3082_v9  }
  0x22   :  { %168 = vperm.xlu0 %2829, %v3047_v0  }
  0x23   :  { %2823 = vset.pattern.permute.xlu1 %v2989_v2 }
  0x24   :  { %51 = vperm.xlu1 %2823, %v3063_v5  }
  0x26   :  { %159 = vperm.xlu0 %2829, %v3082_v9  }
  0x28   :  { %2824 = vset.pattern.permute.xlu1 %v2991_v6 }
  0x29   :  { %186 = vperm.xlu1 %2824, %v3056_v3  }
  0x2a   :  { %172 = vperm.xlu0 %2829, %v3063_v5  }
  0x2d   :  { %2825 = vset.pattern.permute.xlu1 %v2988_v1 }
  0x2e   :  { %2838 = vset.pattern.permute.xlu0 %v2992_v7  ;;  %99 = vperm.xlu1 %2825, %v3082_v9  }
  0x2f   :  { %142 = vperm.xlu0 %2838, %v3063_v5  }
  0x32   :  { %112 = vperm.xlu1 %2825, %v3063_v5  }
  0x33   :  { %132 = vperm.xlu0 %2838, %v3077_v8  }
  0x36   :  { %2828 = vset.pattern.permute.xlu1 %v2994_v12 }
  0x37   :  { %146 = vperm.xlu0 %2838, %v3105_v11   ;;  %216 = vperm.xlu1 %2828, %v3056_v3  }
  0x3b   :  { %2848 = vset.pattern.permute.xlu0 %v2995_v13  ;;  %2830 = vset.pattern.permute.xlu1 %v2990_v4 }
  0x3c   :  { %249 = vperm.xlu0 %2848, %v3082_v9   ;;  %72 = vperm.xlu1 %2830, %v3077_v8  }
  0x40   :  { %262 = vperm.xlu0 %2848, %v3063_v5   ;;  %2831 = vset.pattern.permute.xlu1 %v2992_v7 }
  0x41   :  { %129 = vperm.xlu1 %2831, %v3082_v9  }
  0x44   :  { %2851 = vset.pattern.permute.xlu0 %v2994_v12 }
  0x45   :  { %228 = vperm.xlu0 %2851, %v3047_v0   ;;  %2832 = vset.pattern.permute.xlu1 %v2989_v2 }
  0x46   :  { %56 = vperm.xlu1 %2832, %v3105_v11  }
  0x49   :  { %232 = vperm.xlu0 %2851, %v3063_v5  }
  0x4a   :  { %2833 = vset.pattern.permute.xlu1 %v2990_v4 }
  0x4b   :  { %86 = vperm.xlu1 %2833, %v3105_v11  }
  0x4d   :  { %222 = vperm.xlu0 %2851, %v3077_v8  }
  0x4f   :  { %2834 = vset.pattern.permute.xlu1 %v2995_v13 }
  0x50   :  { %246 = vperm.xlu1 %2834, %v3056_v3  }
  0x51   :  { %236 = vperm.xlu0 %2851, %v3105_v11  }
  0x54   :  { %2835 = vset.pattern.permute.xlu1 %v2988_v1 }
  0x55   :  { %102 = vperm.xlu1 %2835, %v3077_v8   ;;  %2861 = vset.pattern.permute.xlu0 %v2996_v14 }
  0x56   :  { %339 = vperm.xlu0 %2861, %v3082_v9  }
  0x59   :  { %2836 = vset.pattern.permute.xlu1 %v2995_v13 }
  0x5a   :  { %258 = vperm.xlu1 %2836, %v3047_v0   ;;  %352 = vperm.xlu0 %2861, %v3063_v5  }
  0x5e   :  { %2837 = vset.pattern.permute.xlu1 %v2988_v1  ;;  %2864 = vset.pattern.permute.xlu0 %v2997_v15 }
  0x5f   :  { %116 = vperm.xlu1 %2837, %v3105_v11   ;;  %306 = vperm.xlu0 %2864, %v3056_v3  }
  0x63   :  { %2839 = vset.pattern.permute.xlu1 %v2998_v16  ;;  %318 = vperm.xlu0 %2864, %v3047_v0  }
  0x64   :  { %276 = vperm.xlu1 %2839, %v3056_v3  }
  0x67   :  { %322 = vperm.xlu0 %2864, %v3063_v5  }
  0x68   :  { %2840 = vset.pattern.permute.xlu1 %v2991_v6 }
  0x69   :  { %189 = vperm.xlu1 %2840, %v3082_v9  }
  0x6b   :  { %312 = vperm.xlu0 %2864, %v3077_v8  }
  0x6d   :  { %2841 = vset.pattern.permute.xlu1 %v2998_v16 }
  0x6e   :  { %288 = vperm.xlu1 %2841, %v3047_v0  }
  0x6f   :  { %326 = vperm.xlu0 %2864, %v3105_v11  }
  0x72   :  { %2842 = vset.pattern.permute.xlu1 %v2991_v6 }
  0x73   :  { %202 = vperm.xlu1 %2842, %v3063_v5   ;;  %2869 = vset.pattern.permute.xlu0 %v2999_v17 }
  0x74   :  { %486 = vperm.xlu0 %2869, %v3056_v3  }
  0x77   :  { %2843 = vset.pattern.permute.xlu1 %v2993_v10 }
  0x78   :  { %162 = vperm.xlu1 %2843, %v3077_v8   ;;  %498 = vperm.xlu0 %2869, %v3047_v0  }
  0x7c   :  { %2844 = vset.pattern.permute.xlu1 %v2994_v12  ;;  %2872 = vset.pattern.permute.xlu0 %v3000_v18 }
  0x7d   :  { %219 = vperm.xlu1 %2844, %v3082_v9   ;;  %396 = vperm.xlu0 %2872, %v3056_v3  }
  0x81   :  { %v47_v19 = vpop.permute.xlu1 %46  ;;  %2845 = vset.pattern.permute.xlu1 %v2993_v10  ;;  %v109_v20 = vpop.permute.xlu0 %108  ;;  %408 = vperm.xlu0 %2872, %v3047_v0  }
  0x82   :  { %176 = vperm.xlu1 %2845, %v3105_v11  }
  0x85   :  { %412 = vperm.xlu0 %2872, %v3063_v5  }
  0x86   :  { %v79_v21 = vpop.permute.xlu1 %78  ;;  %v67_v22 = vpop.permute.xlu0 %66  ;;  %2846 = vset.pattern.permute.xlu1 %v2996_v14 }
  0x87   :  { %336 = vperm.xlu1 %2846, %v3056_v3   ;;  %vm74_vm0 = vcmp.eq.s32.totalorder %v3168_v28, %v67_v22 }
  0x88   :  { %v89_v34 = vsel %vm74_vm0, %v79_v21, 0.0 }
  0x89   :  { %2876 = vset.pattern.permute.xlu0 %v3001_v23 }
  0x8a   :  { %v3161_v24 = vpop.permute.xlu0 %82  ;;  %386 = vperm.xlu0 %2876, %v3105_v11  }
  0x8b   :  { %2847 = vset.pattern.permute.xlu1 %v2991_v6  ;;  %v97_v26 = vpop.permute.xlu1 %96 }
  0x8c   :  { %192 = vperm.xlu1 %2847, %v3077_v8   ;;  %vm104_vm1 = vcmp.eq.s32.totalorder %v3168_v28, %v97_v26 }
  0x8d   :  { %v119_v37 = vsel %vm104_vm1, %v109_v20, 0.0 }
  0x8e   :  { %2878 = vset.pattern.permute.xlu0 %v3002_v27 }
  0x8f   :  { %v199_v29 = vpop.permute.xlu0 %198  ;;  %459 = vperm.xlu0 %2878, %v3082_v9  }
  0x90   :  { %2849 = vset.pattern.permute.xlu1 %v2996_v14  ;;  %v127_v30 = vpop.permute.xlu1 %126 }
  0x91   :  { %348 = vperm.xlu1 %2849, %v3047_v0   ;;  %vm134_vm3 = vcmp.eq.s32.totalorder %v3168_v28, %v127_v30 }
  0x93   :  { %2880 = vset.pattern.permute.xlu0 %v3003_v31 }
  0x94   :  { %v34_v32 = vpop.permute.xlu0 %33  ;;  %v139_v33 = vpop.permute.xlu1 %138  ;;  %432 = vperm.xlu0 %2880, %v3077_v8  }
  0x95   :  { %vm41_vm2 = vcmp.eq.s32.totalorder %v3168_v28, %v34_v32  ;;  %2850 = vset.pattern.permute.xlu1 %v2991_v6  ;;  %v149_v43 = vsel %vm134_vm3, %v139_v33, 0.0  ;;  %v515_v32 = vld [vmem:[%s3824_s2] sm:$0xff]  ;;  %v516_v33 = vld [vmem:[%s3824_s2 + $0x8] sm:$0xff] }
  0x96   :  { %v59_v35 = vsel %vm41_vm2, %v47_v19, 0.0  ;;  %206 = vperm.xlu1 %2850, %v3105_v11  }
  0x97   :  { %v92_v36 = vadd.f32 %v89_v34, %v59_v35  ;;  %v2651_v34 = vpack.c.bf16 %v516_v33, %v515_v32 }
  0x98   :  { %v3180_v38 = vpop.permute.xlu0 %39  ;;  %2883 = vset.pattern.permute.xlu0 %v2999_v17 }
  0x99   :  { %v122_v39 = vadd.f32 %v119_v37, %v92_v36  ;;  %v37_v40 = vpop.permute.xlu1 %36  ;;  %502 = vperm.xlu0 %2883, %v3063_v5   ;;  %v3004_v36 = vmov 0.0|0.0   ;;  %vm43_vm0 = vcmp.eq.s32.totalorder %v3168_v28, %v3180_v38 }
  0x9a   :  { %2852 = vset.pattern.permute.xlu1 %v3001_v23  ;;  %vm42_vm8 = vcmp.eq.s32.totalorder %v3168_v28, %v37_v40  ;;  %2650 = vmatprep.subr.bf16.mxu0 %v3004_v36  ;;  %v518_v40 = vld [vmem:[%s3824_s2 + $0x18] sm:$0xff] }
  0x9b   :  { %366 = vperm.xlu1 %2852, %v3056_v3   ;;  %v152_v44 = vadd.f32 %v149_v43, %v122_v39  ;;  %2652 = vmatpush3.bf16.msra.mxu0 %v2651_v34  ;;  %v517_v39 = vld [vmem:[%s3824_s2 + $0x10] sm:$0xff] }
  0x9c   :  { %2653 = vmatprep.subr.bf16.mxu0 %v3004_v36 }
  0x9d   :  { %v157_v41 = vpop.permute.xlu0 %156  ;;  %492 = vperm.xlu0 %2883, %v3077_v8  }
  0x9e   :  { %v70_v42 = vpop.permute.xlu1 %69  ;;  %vm164_vm4 = vcmp.eq.s32.totalorder %v3168_v28, %v157_v41  ;;  %v2654_v41 = vpack.c.bf16 %v518_v40, %v517_v39 }
  0x9f   :  { %2853 = vset.pattern.permute.xlu1 %v2998_v16  ;;  %vm75_vm9 = vcmp.eq.s32.totalorder %v3168_v28, %v70_v42 }
  0xa0   :  { %279 = vperm.xlu1 %2853, %v3082_v9   ;;  %v90_v4 = vsel %vm75_vm9, %v3161_v24, 0.0  ;;  %2655 = vmatpush3.bf16.msra.mxu0 %v2654_v41 }
  0xa1   :  { %v169_v45 = vpop.permute.xlu0 %168  ;;  %2887 = vset.pattern.permute.xlu0 %v2989_v2  ;;  %2656 = vmatprep.subr.bf16.mxu0 %v3004_v36 }
  0xa2   :  { %v179_v46 = vsel %vm164_vm4, %v169_v45, 0.0  ;;  %v520_v45 = vld [vmem:[%s3824_s2 + $0x28] sm:$0xff]  ;;  %vm3006_vm4 = vmmov 0  }
  0xa3   :  { %v182_v47 = vadd.f32 %v179_v46, %v152_v44  ;;  %v52_v48 = vpop.permute.xlu1 %51  ;;  %v519_v44 = vld [vmem:[%s3824_s2 + $0x20] sm:$0xff] }
  0xa4   :  { %2854 = vset.pattern.permute.xlu1 %v3001_v23  ;;  %v60_v1 = vsel %vm42_vm8, %v52_v48, 0.0 }
  0xa5   :  { %378 = vperm.xlu1 %2854, %v3047_v0   ;;  %v160_v49 = vpop.permute.xlu0 %159  ;;  %v93_v7 = vadd.f32 %v90_v4, %v60_v1  ;;  %v523_v1 = vld [vmem:[%s3824_s2 + $0x40] sm:$0xff] }
  0xa6   :  { %vm165_vm5 = vcmp.eq.s32.totalorder %v3168_v28, %v160_v49 }
  0xa8   :  { %v187_v50 = vpop.permute.xlu1 %186 }
  0xa9   :  { %vm194_vm6 = vcmp.eq.s32.totalorder %v3168_v28, %v187_v50  ;;  %2855 = vset.pattern.permute.xlu1 %v2998_v16  ;;  %v173_v51 = vpop.permute.xlu0 %172  ;;  %v521_v50 = vld [vmem:[%s3824_s2 + $0x30] sm:$0xff] }
  0xaa   :  { %v209_v52 = vsel %vm194_vm6, %v199_v29, 0.0  ;;  %292 = vperm.xlu1 %2855, %v3063_v5   ;;  %v180_v53 = vsel %vm165_vm5, %v173_v51, 0.0  ;;  %v522_v51 = vld [vmem:[%s3824_s2 + $0x38] sm:$0xff] }
  0xab   :  { %v3198_v54 = vadd.f32 %v209_v52, %v182_v47 }
  0xad   :  { %v100_v55 = vpop.permute.xlu1 %99 }
  0xae   :  { %2856 = vset.pattern.permute.xlu1 %v2995_v13  ;;  %v143_v56 = vpop.permute.xlu0 %142  ;;  %vm105_vm10 = vcmp.eq.s32.totalorder %v3168_v28, %v100_v55 }
  0xaf   :  { %252 = vperm.xlu1 %2856, %v3077_v8  }
  0xb1   :  { %v113_v57 = vpop.permute.xlu1 %112 }
  0xb2   :  { %v133_v58 = vpop.permute.xlu0 %132  ;;  %v120_v6 = vsel %vm105_vm10, %v113_v57, 0.0 }
  0xb3   :  { %2857 = vset.pattern.permute.xlu1 %v2997_v15  ;;  %vm136_vm7 = vcmp.eq.s32.totalorder %v3168_v28, %v133_v58  ;;  %v123_v15 = vadd.f32 %v120_v6, %v93_v7 }
  0xb4   :  { %309 = vperm.xlu1 %2857, %v3082_v9  }
  0xb6   :  { %v217_v59 = vpop.permute.xlu1 %216  ;;  %v147_v60 = vpop.permute.xlu0 %146 }
  0xb7   :  { %v3205_v61 = vsel %vm136_vm7, %v147_v60, 0.0  ;;  %vm224_vm14 = vcmp.eq.s32.totalorder %v3168_v28, %v217_v59 }
  0xb8   :  { %2858 = vset.pattern.permute.xlu1 %v2995_v13 }
  0xb9   :  { %266 = vperm.xlu1 %2858, %v3105_v11  }
  0xbb   :  { %v3211_v62 = vpop.permute.xlu1 %72  ;;  %v250_v63 = vpop.permute.xlu0 %249 }
  0xbc   :  { %vm255_vm11 = vcmp.eq.s32.totalorder %v3168_v28, %v250_v63  ;;  %vm76_vm2 = vcmp.eq.s32.totalorder %v3168_v28, %v3211_v62  ;;  %v3005_v63 = vmov 0.0  }
  0xbd   :  { %2859 = vset.pattern.permute.xlu1 %v3003_v31  ;;  %733 = vmatprep.mubr.f32.mxu1 %v3005_v63 }
  0xbe   :  { %426 = vperm.xlu1 %2859, %v3056_v3   ;;  %2494 = vmatprep.mubr.msk.f32.mxu0 %vm3006_vm4, %v3005_v63 }
  0xbf   :  { %v263_v10 = vpop.permute.xlu0 %262 }
  0xc0   :  { %v3218_v12 = vsel %vm255_vm11, %v263_v10, 0.0  ;;  %v130_v13 = vpop.permute.xlu1 %129 }
  0xc1   :  { %vm135_vm12 = vcmp.eq.s32.totalorder %v3168_v28, %v130_v13 }
  0xc2   :  { %v150_v19 = vsel %vm135_vm12, %v143_v56, 0.0  ;;  %2860 = vset.pattern.permute.xlu1 %v2998_v16 }
  0xc3   :  { %v153_v20 = vadd.f32 %v150_v19, %v123_v15  ;;  %282 = vperm.xlu1 %2860, %v3077_v8  }
  0xc4   :  { %v229_v21 = vpop.permute.xlu0 %228 }
  0xc5   :  { %v57_v22 = vpop.permute.xlu1 %56  ;;  %v3223_v24 = vadd.f32 %v180_v53, %v153_v20  ;;  %v239_v46 = vsel %vm224_vm14, %v229_v21, 0.0 }
  0xc6   :  { %v242_v47 = vadd.f32 %v239_v46, %v3198_v54  ;;  %v2660_v54 = vpack.c.bf16 %v522_v51, %v521_v50  ;;  %v61_v57 = vsel %vm43_vm0, %v57_v22, 0.0 }
  0xc7   :  { %2862 = vset.pattern.permute.xlu1 %v3003_v31 }
  0xc8   :  { %438 = vperm.xlu1 %2862, %v3047_v0   ;;  %v3227_v26 = vpop.permute.xlu0 %232 }
  0xca   :  { %v87_v29 = vpop.permute.xlu1 %86 }
  0xcb   :  { %v91_v55 = vsel %vm76_vm2, %v87_v29, 0.0 }
  0xcc   :  { %2863 = vset.pattern.permute.xlu1 %v2998_v16  ;;  %v223_v30 = vpop.permute.xlu0 %222  ;;  %v94_v58 = vadd.f32 %v91_v55, %v61_v57  ;;  %v622_v55 = vld [vmem:[%s3825_s3 + $0x40] sm:$0xff]  ;;  %v627_v57 = vld [vmem:[%s3825_s3 + $0x68] sm:$0xff] }
  0xcd   :  { %296 = vperm.xlu1 %2863, %v3105_v11   ;;  %vm226_vm13 = vcmp.eq.s32.totalorder %v3168_v28, %v223_v30 }
  0xcf   :  { %v247_v35 = vpop.permute.xlu1 %246 }
  0xd0   :  { %v237_v37 = vpop.permute.xlu0 %236  ;;  %vm254_vm1 = vcmp.eq.s32.totalorder %v3168_v28, %v247_v35 }
  0xd1   :  { %2865 = vset.pattern.permute.xlu1 %v3002_v27  ;;  %v3240_v16 = vsel %vm226_vm13, %v237_v37, 0.0 }
  0xd2   :  { %456 = vperm.xlu1 %2865, %v3056_v3   ;;  %v2657_v3 = vpack.c.bf16 %v520_v45, %v519_v44  ;;  %v621_v44 = vld [vmem:[%s3825_s3 + $0x38] sm:$0xff] }
  0xd4   :  { %v103_v42 = vpop.permute.xlu1 %102  ;;  %2658 = vmatpush3.bf16.msra.mxu0 %v2657_v3 }
  0xd5   :  { %v340_v43 = vpop.permute.xlu0 %339  ;;  %2659 = vmatprep.subr.bf16.mxu0 %v3004_v36  ;;  %vm106_vm3 = vcmp.eq.s32.totalorder %v3168_v28, %v103_v42 }
  0xd6   :  { %2866 = vset.pattern.permute.xlu1 %v3001_v23  ;;  %vm345_vm15 = vcmp.eq.s32.totalorder %v3168_v28, %v340_v43  ;;  %v615_v43 = vld [vmem:[%s3825_s3 + $0x8] sm:$0xff] }
  0xd7   :  { %369 = vperm.xlu1 %2866, %v3082_v9  }
  0xd8   :  { %2661 = vmatpush3.bf16.msra.mxu0 %v2660_v54 }
  0xd9   :  { %v259_v48 = vpop.permute.xlu1 %258  ;;  %v353_v49 = vpop.permute.xlu0 %352  ;;  %2492 = vmatprep.subr.mxu0 %v3005_v63 }
  0xda   :  { %v269_v52 = vsel %vm254_vm1, %v259_v48, 0.0  ;;  %v3274_v53 = vsel %vm345_vm15, %v353_v49, 0.0  ;;  %v620_v48 = vld [vmem:[%s3825_s3 + $0x30] sm:$0xff]  ;;  %v623_v49 = vld [vmem:[%s3825_s3 + $0x48] sm:$0xff] }
  0xdb   :  { %v272_v56 = vadd.f32 %v269_v52, %v242_v47  ;;  %2867 = vset.pattern.permute.xlu1 %v3002_v27  ;;  %v618_v47 = vld [vmem:[%s3825_s3 + $0x20] sm:$0xff] }
  0xdc   :  { %468 = vperm.xlu1 %2867, %v3047_v0   ;;  %2493 = vmatpush3.msra.mxu0 %v523_v1  ;;  %v2668_v52 = vpack.c.bf16 %v620_v48, %v618_v47 }
  0xde   :  { %v117_v59 = vpop.permute.xlu1 %116  ;;  %v3282_v60 = vpop.permute.xlu0 %306 }
  0xdf   :  { %v121_v62 = vsel %vm106_vm3, %v117_v59, 0.0  ;;  %vm314_vm14 = vcmp.eq.s32.totalorder %v3168_v28, %v3282_v60 }
  0xe0   :  { %v124_v0 = vadd.f32 %v121_v62, %v94_v58  ;;  %2868 = vset.pattern.permute.xlu1 %v3001_v23  ;;  %v629_v58 = vld [vmem:[%s3825_s3 + $0x78] sm:$0xff] }
  0xe1   :  { %382 = vperm.xlu1 %2868, %v3063_v5   ;;  %v2674_v1 = vpack.c.bf16 %v629_v58, %v627_v57 }
  0xe2   :  { %v3293_v38 = vpop.permute.xlu0 %318  ;;  %v154_v4 = vadd.f32 %v3205_v61, %v124_v0  ;;  %v626_v0 = vld [vmem:[%s3825_s3 + $0x60] sm:$0xff] }
  0xe3   :  { %v277_v6 = vpop.permute.xlu1 %276 }
  0xe4   :  { %vm284_vm6 = vcmp.eq.s32.totalorder %v3168_v28, %v277_v6 }
  0xe5   :  { %2870 = vset.pattern.permute.xlu1 %v2996_v14 }
  0xe6   :  { %342 = vperm.xlu1 %2870, %v3077_v8   ;;  %v3298_v7 = vpop.permute.xlu0 %322 }
  0xe8   :  { %v190_v10 = vpop.permute.xlu1 %189 }
  0xe9   :  { %vm195_vm7 = vcmp.eq.s32.totalorder %v3168_v28, %v190_v10 }
  0xea   :  { %2871 = vset.pattern.permute.xlu1 %v3000_v18  ;;  %v313_v13 = vpop.permute.xlu0 %312 }
  0xeb   :  { %399 = vperm.xlu1 %2871, %v3082_v9   ;;  %vm316_vm5 = vcmp.eq.s32.totalorder %v3168_v28, %v313_v13 }
  0xed   :  { %v289_v15 = vpop.permute.xlu1 %288 }
  0xee   :  { %v299_v19 = vsel %vm284_vm6, %v289_v15, 0.0  ;;  %v327_v61 = vpop.permute.xlu0 %326 }
  0xef   :  { %v3304_v20 = vadd.f32 %v299_v19, %v272_v56  ;;  %2873 = vset.pattern.permute.xlu1 %v2996_v14  ;;  %v3307_v21 = vsel %vm316_vm5, %v327_v61, 0.0  ;;  %v624_v56 = vld [vmem:[%s3825_s3 + $0x50] sm:$0xff] }
  0xf0   :  { %356 = vperm.xlu1 %2873, %v3105_v11   ;;  %v2672_v62 = vpack.c.bf16 %v624_v56, %v622_v55 }
  0xf2   :  { %v203_v22 = vpop.permute.xlu1 %202 }
  0xf3   :  { %v210_v29 = vsel %vm195_vm7, %v203_v22, 0.0  ;;  %vm524_vm7 = vcmask 588800  }
  0xf4   :  { %v213_v30 = vadd.f32 %v210_v29, %v3223_v24  ;;  %2874 = vset.pattern.permute.xlu1 %v3001_v23 }
  0xf5   :  { %372 = vperm.xlu1 %2874, %v3077_v8  }
  0xf7   :  { %v163_v32 = vpop.permute.xlu1 %162 }
  0xf8   :  { %vm166_vm9 = vcmp.eq.s32.totalorder %v3168_v28, %v163_v32  ;;  %v487_v32 = vpop.permute.xlu0 %486 }
  0xf9   :  { %2875 = vset.pattern.permute.xlu1 %v3003_v31  ;;  %vm494_vm5 = vcmp.eq.s32.totalorder %v3168_v28, %v487_v32 }
  0xfa   :  { %429 = vperm.xlu1 %2875, %v3082_v9  }
  0xfc   :  { %v220_v14 = vpop.permute.xlu1 %219 }
  0xfd   :  { %vm225_vm8 = vcmp.eq.s32.totalorder %v3168_v28, %v220_v14 }
  0xfe   :  { %v240_v33 = vsel %vm225_vm8, %v3227_v26, 0.0  ;;  %442 = vperm.xlu1 %2875, %v3063_v5  }
  0xff   :  { %v243_v34 = vadd.f32 %v240_v33, %v213_v30  ;;  %v499_v33 = vpop.permute.xlu0 %498 }
 0x101   :  { %v177_v24 = vpop.permute.xlu1 %176  ;;  %v273_v23 = vadd.f32 %v3218_v12, %v243_v34 }
 0x102   :  { %v181_v35 = vsel %vm166_vm9, %v177_v24, 0.0  ;;  %2877 = vset.pattern.permute.xlu1 %v3000_v18 }
 0x103   :  { %v184_v37 = vadd.f32 %v181_v35, %v154_v4  ;;  %402 = vperm.xlu1 %2877, %v3077_v8   ;;  %v628_v4 = vld [vmem:[%s3825_s3 + $0x70] sm:$0xff]  ;;  %v397_v24 = vpop.permute.xlu0 %396  ;;  %v329_v35 = vsel %vm314_vm14, %v3293_v38, 0.0 }
 0x104   :  { %v2676_v10 = vpack.c.bf16 %v628_v4, %v626_v0  ;;  %vm404_vm2 = vcmp.eq.s32.totalorder %v3168_v28, %v397_v24 }
 0x106   :  { %v3323_v39 = vpop.permute.xlu1 %336 }
 0x107   :  { %416 = vperm.xlu1 %2877, %v3105_v11   ;;  %vm344_vm0 = vcmp.eq.s32.totalorder %v3168_v28, %v3323_v39  ;;  %v409_v38 = vpop.permute.xlu0 %408 }
 0x10b   :  { %2879 = vset.pattern.permute.xlu1 %v3002_v27  ;;  %v193_v26 = vpop.permute.xlu1 %192 }
 0x10c   :  { %472 = vperm.xlu1 %2879, %v3063_v5   ;;  %vm196_vm10 = vcmp.eq.s32.totalorder %v3168_v28, %v193_v26 }
 0x110   :  { %2881 = vset.pattern.permute.xlu1 %v2999_v17  ;;  %v3329_v40 = vpop.permute.xlu1 %348 }
 0x111   :  { %489 = vperm.xlu1 %2881, %v3082_v9  }
 0x115   :  { %2882 = vset.pattern.permute.xlu1 %v3003_v31  ;;  %v207_v18 = vpop.permute.xlu1 %206 }
 0x116   :  { %v211_v12 = vsel %vm196_vm10, %v207_v18, 0.0  ;;  %446 = vperm.xlu1 %2882, %v3105_v11   ;;  %v332_v18 = vadd.f32 %v329_v35, %v3304_v20 }
 0x117   :  { %v214_v41 = vadd.f32 %v211_v12, %v184_v37 }
 0x119   :  { %v244_v42 = vadd.f32 %v3240_v16, %v214_v41 }
 0x11a   :  { %2884 = vset.pattern.permute.xlu1 %v3002_v27  ;;  %v3337_v5 = vpop.permute.xlu1 %366  ;;  %v617_v27 = vld [vmem:[%s3825_s3 + $0x18] sm:$0xff] }
 0x11b   :  { %462 = vperm.xlu1 %2884, %v3077_v8   ;;  %v614_v8 = vld [vmem:[%s3825_s3] sm:$0xff]  ;;  %v2662_v16 = vpack.c.bf16 %v617_v27, %v615_v43  ;;  %vm374_vm1 = vcmp.eq.s32.totalorder %v3168_v28, %v3337_v5  ;;  %v509_v43 = vsel %vm494_vm5, %v499_v33, 0.0  ;;  %vm1125_vm5 = vcmask 261120  }
 0x11d   :  { %2663 = vmatprep.subr.bf16.mxu1 %v2662_v16 }
 0x11f   :  { %476 = vperm.xlu1 %2884, %v3105_v11   ;;  %v280_v9 = vpop.permute.xlu1 %279 }
 0x120   :  { %vm285_vm11 = vcmp.eq.s32.totalorder %v3168_v28, %v280_v9  ;;  %v419_v9 = vsel %vm404_vm2, %v409_v38, 0.0  ;;  %v637_v38 = vld [vmem:[%s3825_s3 + $0xb8] sm:$0xff] }
 0x123   :  { %2885 = vset.pattern.permute.xlu1 %v2999_v17  ;;  %v616_v17 = vld [vmem:[%s3825_s3 + $0x10] sm:$0xff] }
 0x124   :  { %506 = vperm.xlu1 %2885, %v3105_v11   ;;  %v3343_v31 = vpop.permute.xlu1 %378  ;;  %v619_v11 = vld [vmem:[%s3825_s3 + $0x28] sm:$0xff]  ;;  %v2664_v46 = vpack.c.bf16 %v616_v17, %v614_v8 }
 0x125   :  { %v2666_v3 = vpack.c.bf16 %v621_v44, %v619_v11  ;;  %v389_v12 = vsel %vm374_vm1, %v3343_v31, 0.0 }
 0x126   :  { %2665 = vmatpush1.bf16.msra.mxu1 %v2664_v46 }
 0x127   :  { %2667 = vmatprep.subr.bf16.mxu1 %v2666_v3  ;;  %v413_v3 = vpop.permute.xlu0 %412 }
 0x128   :  { %2886 = vset.pattern.permute.xlu1 %v2989_v2  ;;  %v625_v2 = vld [vmem:[%s3825_s3 + $0x58] sm:$0xff] }
 0x129   :  { %v293_v45 = vpop.permute.xlu1 %292  ;;  %v2670_v54 = vpack.c.bf16 %v625_v2, %v623_v49 }
 0x12a   :  { %v300_v50 = vsel %vm285_vm11, %v293_v45, 0.0  ;;  %2669 = vmatpush1.bf16.msra.mxu1 %v2668_v52 }
 0x12b   :  { %v303_v51 = vadd.f32 %v300_v50, %v273_v23  ;;  %2671 = vmatprep.subr.bf16.mxu1 %v2670_v54  ;;  %v387_v48 = vpop.permute.xlu0 %386 }
 0x12e   :  { %v253_v59 = vpop.permute.xlu1 %252  ;;  %2673 = vmatpush1.bf16.msra.mxu1 %v2672_v62 }
 0x12f   :  { %2675 = vmatprep.subr.bf16.mxu1 %v2674_v1  ;;  %vm256_vm13 = vcmp.eq.s32.totalorder %v3168_v28, %v253_v59  ;;  %v460_v50 = vpop.permute.xlu0 %459 }
 0x130   :  { %vm465_vm11 = vcmp.eq.s32.totalorder %v3168_v28, %v460_v50 }
 0x132   :  { %2677 = vmatpush1.bf16.msra.mxu1 %v2676_v10 }
 0x133   :  { %v310_v6 = vpop.permute.xlu1 %309  ;;  %v433_v52 = vpop.permute.xlu0 %432 }
 0x134   :  { %vm315_vm12 = vcmp.eq.s32.totalorder %v3168_v28, %v310_v6 }
 0x135   :  { %v330_v13 = vsel %vm315_vm12, %v3298_v7, 0.0 }
 0x136   :  { %v333_v15 = vadd.f32 %v330_v13, %v303_v51 }
 0x137   :  { %v503_v1 = vpop.permute.xlu0 %502 }
 0x138   :  { %v267_v19 = vpop.permute.xlu1 %266  ;;  %v363_v61 = vadd.f32 %v3274_v53, %v333_v15  ;;  %v359_v53 = vsel %vm344_vm0, %v3329_v40, 0.0  ;;  %vm436_vm0 = vcmp.eq.s32.totalorder %v3168_v28, %v433_v52 }
 0x139   :  { %v271_v22 = vsel %vm256_vm13, %v267_v19, 0.0  ;;  %v362_v41 = vadd.f32 %v359_v53, %v332_v18  ;;  %v633_v18 = vld [vmem:[%s3825_s3 + $0x98] sm:$0xff] }
 0x13a   :  { %v274_v29 = vadd.f32 %v271_v22, %v244_v42 }
 0x13b   :  { %v392_v42 = vadd.f32 %v389_v12, %v362_v41  ;;  %v632_v12 = vld [vmem:[%s3825_s3 + $0x90] sm:$0xff]  ;;  %v635_v41 = vld [vmem:[%s3825_s3 + $0xa8] sm:$0xff] }
 0x13d   :  { %v427_v30 = vpop.permute.xlu1 %426 }
 0x13e   :  { %vm434_vm3 = vcmp.eq.s32.totalorder %v3168_v28, %v427_v30 }
 0x142   :  { %v283_v14 = vpop.permute.xlu1 %282 }
 0x143   :  { %vm286_vm15 = vcmp.eq.s32.totalorder %v3168_v28, %v283_v14 }
 0x147   :  { %v439_v34 = vpop.permute.xlu1 %438 }
 0x148   :  { %v449_v40 = vsel %vm434_vm3, %v439_v34, 0.0  ;;  %v493_v34 = vpop.permute.xlu0 %492  ;;  %vm659_vm3 = vcmask 523264  }
 0x149   :  { %vm496_vm2 = vcmp.eq.s32.totalorder %v3168_v28, %v493_v34 }
 0x14c   :  { %v297_v7 = vpop.permute.xlu1 %296 }
 0x14d   :  { %v301_v23 = vsel %vm286_vm15, %v297_v7, 0.0 }
 0x14e   :  { %v304_v37 = vadd.f32 %v301_v23, %v274_v29 }
 0x150   :  { %v3407_v26 = vadd.f32 %v3307_v21, %v304_v37  ;;  %v422_v21 = vadd.f32 %v419_v9, %v392_v42  ;;  %v2682_v9 = vpack.c.bf16 %v637_v38, %v635_v41 }
 0x151   :  { %v457_v60 = vpop.permute.xlu1 %456 }
 0x152   :  { %v452_v20 = vadd.f32 %v449_v40, %v422_v21  ;;  %vm464_vm6 = vcmp.eq.s32.totalorder %v3168_v28, %v457_v60  ;;  %v636_v40 = vld [vmem:[%s3825_s3 + $0xb0] sm:$0xff]  ;;  %v639_v21 = vld [vmem:[%s3825_s3 + $0xc8] sm:$0xff] }
 0x156   :  { %v370_v39 = vpop.permute.xlu1 %369 }
 0x157   :  { %vm375_vm8 = vcmp.eq.s32.totalorder %v3168_v28, %v370_v39  ;;  %v634_v39 = vld [vmem:[%s3825_s3 + $0xa0] sm:$0xff] }
 0x15b   :  { %v469_v5 = vpop.permute.xlu1 %468 }
 0x15c   :  { %v479_v27 = vsel %vm464_vm6, %v469_v5, 0.0  ;;  %v2684_v5 = vpack.c.bf16 %v636_v40, %v634_v39  ;;  %vm3723_vm6 = vmpackc.low %vm659_vm3, %vm659_vm3 }
 0x15d   :  { %v482_v31 = vadd.f32 %v479_v27, %v452_v20  ;;  %v641_v20 = vld [vmem:[%s3825_s3 + $0xd8] sm:$0xff]  ;;  %v638_v27 = vld [vmem:[%s3825_s3 + $0xc0] sm:$0xff] }
 0x15f   :  { %v512_v8 = vadd.f32 %v509_v43, %v482_v31  ;;  %v2686_v43 = vpack.c.bf16 %v641_v20, %v639_v21  ;;  %v640_v31 = vld [vmem:[%s3825_s3 + $0xd0] sm:$0xff] }
 0x160   :  { %v383_v16 = vpop.permute.xlu1 %382 }
 0x161   :  { %2495 = vmatmul.mubr.msk.f32.vlgmr.msra.gmra.mrb[0].mxu0 %vm524_vm7, %v512_v8  ;;  %v390_v51 = vsel %vm375_vm8, %v383_v16, 0.0  ;;  %v2688_v8 = vpack.c.bf16 %v640_v31, %v638_v27  ;;  %v643_v16 = vld [vmem:[%s3825_s3 + $0xe8] sm:$0xff]  ;;  %vm2303_vm8 = vcmask 1042432  }
 0x162   :  { %2497 = vmatprep.mubr.msk.f32.mxu0 %vm3006_vm4, %v3005_v63  ;;  %v393_v55 = vadd.f32 %v390_v51, %v363_v61 }
 0x165   :  { %v343_v17 = vpop.permute.xlu1 %342 }
 0x166   :  { %vm346_vm13 = vcmp.eq.s32.totalorder %v3168_v28, %v343_v17  ;;  %v645_v17 = vld [vmem:[%s3825_s3 + $0xf8] sm:$0xff] }
 0x16a   :  { %v400_v11 = vpop.permute.xlu1 %399 }
 0x16b   :  { %vm405_vm9 = vcmp.eq.s32.totalorder %v3168_v28, %v400_v11  ;;  %v2690_v11 = vpack.c.bf16 %v645_v17, %v643_v16 }
 0x16c   :  { %v420_v54 = vsel %vm405_vm9, %v413_v3, 0.0  ;;  %vm2305_vm9 = vcmask 1043456  }
 0x16d   :  { %v423_v58 = vadd.f32 %v420_v54, %v393_v55 }
 0x16f   :  { %v357_v44 = vpop.permute.xlu1 %356 }
 0x170   :  { %v361_v15 = vsel %vm346_vm13, %v357_v44, 0.0  ;;  %v642_v44 = vld [vmem:[%s3825_s3 + $0xe0] sm:$0xff]  ;;  %vm2315_vm13 = vcmask 195584  }
 0x171   :  { %v364_v22 = vadd.f32 %v361_v15, %v3407_v26  ;;  %v631_v26 = vld [vmem:[%s3825_s3 + $0x88] sm:$0xff] }
 0x172   :  { %v2678_v60 = vpack.c.bf16 %v633_v18, %v631_v26 }
 0x174   :  { %v373_v45 = vpop.permute.xlu1 %372  ;;  %2679 = vmatprep.subr.bf16.mxu1 %v2678_v60  ;;  %2695 = vmatprep.subr.bf16.mxu0 %v2678_v60 }
 0x175   :  { %vm376_vm14 = vcmp.eq.s32.totalorder %v3168_v28, %v373_v45  ;;  %v644_v45 = vld [vmem:[%s3825_s3 + $0xf0] sm:$0xff] }
 0x176   :  { %v391_v19 = vsel %vm376_vm14, %v387_v48, 0.0 }
 0x177   :  { %v394_v30 = vadd.f32 %v391_v19, %v364_v22 }
 0x179   :  { %v430_v46 = vpop.permute.xlu1 %429 }
 0x17a   :  { %vm435_vm10 = vcmp.eq.s32.totalorder %v3168_v28, %v430_v46  ;;  %v2692_v46 = vpack.c.bf16 %v644_v45, %v642_v44 }
 0x17d   :  { %v443_v47 = vpop.permute.xlu1 %442 }
 0x17e   :  { %v450_v57 = vsel %vm435_vm10, %v443_v47, 0.0  ;;  %vm2307_vm10 = vcmask 1044480  }
 0x17f   :  { %v453_v62 = vadd.f32 %v450_v57, %v423_v58  ;;  %v646_v58 = vld [vmem:[%s3827_s5] ss:$8 sm:$0x3] }
 0x182   :  { %v403_v49 = vpop.permute.xlu1 %402 }
 0x183   :  { %vm406_vm15 = vcmp.eq.s32.totalorder %v3168_v28, %v403_v49 }
 0x186   :  { %v417_v2 = vpop.permute.xlu1 %416 }
 0x187   :  { %v421_v29 = vsel %vm406_vm15, %v417_v2, 0.0 }
 0x188   :  { %v424_v33 = vadd.f32 %v421_v29, %v394_v30 }
 0x18b   :  { %v473_v56 = vpop.permute.xlu1 %472 }
 0x18c   :  { %v480_v59 = vsel %vm465_vm11, %v473_v56, 0.0  ;;  %v3496_v56 = vshrl.u32 %v30_v25, 7  ;;  %vm2309_vm11 = vcmask 1045504  }
 0x18d   :  { %v483_v4 = vadd.f32 %v480_v59, %v453_v62 }
 0x18e   :  { %v651_v57 = vsub.s32 0, %v3496_v56  ;;  %v655_v19 = vsub.s32 1, %v3496_v56 }
 0x190   :  { %v490_v0 = vpop.permute.xlu1 %489  ;;  %v652_v59 = vrot.slane %v646_v58, %v651_v57  ;;  %v656_v22 = vrot.slane %v646_v58, %v655_v19 }
 0x191   :  { %vm495_vm12 = vcmp.eq.s32.totalorder %v3168_v28, %v490_v0 }
 0x192   :  { %v510_v6 = vsel %vm495_vm12, %v503_v1, 0.0  ;;  %vm2311_vm12 = vcmask 1046528  }
 0x193   :  { %v513_v10 = vadd.f32 %v510_v6, %v483_v4 }
 0x195   :  { %2498 = vmatmul.mubr.msk.f32.gmra.mrb[2].mxu0 %vm524_vm7, %v513_v10  ;;  %v447_v13 = vpop.permute.xlu1 %446 }
 0x196   :  { %2500 = vmatprep.mubr.msk.f32.mxu0 %vm3006_vm4, %v3005_v63  ;;  %v451_v32 = vsel %vm436_vm0, %v447_v13, 0.0 }
 0x197   :  { %v454_v24 = vadd.f32 %v451_v32, %v424_v33 }
 0x19a   :  { %v463_v61 = vpop.permute.xlu1 %462 }
 0x19b   :  { %vm466_vm1 = vcmp.eq.s32.totalorder %v3168_v28, %v463_v61  ;;  %v630_v28 = vld [vmem:[%s3825_s3 + $0x80] sm:$0xff]  ;;  %s2964_s3 = scalar_lea.vmem %s2340_s1, 128 }
 0x19c   :  { %v2680_v42 = vpack.c.bf16 %v632_v12, %v630_v28  ;;  %v647_v61 = vld [vmem:[%s3827_s5 + $0x1] ss:$0 sm:$0xff]  ;;  %p2965_p0 = scmp.ne.s32.totalorder %s2340_s1, %s2964_s3  ;;  %p2970_p2 = scmp.lt.s32.totalorder %s2964_s3, %s2964_s3 }
 0x19e   :  { %v477_v14 = vpop.permute.xlu1 %476  ;;  %2697 = vmatpush1.bf16.msra.mxu0 %v2680_v42  ;;  %p2971_p3 = por %p2970_p2, %p2969_p1 }
 0x19f   :  { %v481_v7 = vsel %vm466_vm1, %v477_v14, 0.0  ;;  %2699 = vmatprep.subr.bf16.mxu0 %v2682_v9 }
 0x1a0   :  { %v484_v23 = vadd.f32 %v481_v7, %v454_v24  ;;  %p2972_p4 = pnand %p2971_p3, %p2965_p0 }
 0x1a2   :  { %2701 = vmatpush1.bf16.msra.mxu0 %v2684_v5 }
 0x1a3   :  { %v507_v35 = vpop.permute.xlu1 %506  ;;  %2703 = vmatprep.subr.bf16.mxu0 %v2686_v43 }
 0x1a4   :  { %v511_v37 = vsel %vm496_vm2, %v507_v35, 0.0 }
 0x1a5   :  { %v514_v53 = vadd.f32 %v511_v37, %v484_v23 }
 0x1a6   :  { %2705 = vmatpush1.bf16.msra.mxu0 %v2688_v8 }
 0x1a7   :  { %2501 = vmatmul.mubr.msk.f32.gmra.mrb[4].mxu0 %vm524_vm7, %v514_v53  ;;  %2707 = vmatprep.subr.bf16.mxu0 %v2690_v11  ;;  %vm2301_vm7 = vcmask 1041408  }
 0x1a8   :  { %914 = vmatprep.mubr.f32.mxu0 %v3005_v63 }
 0x1aa   :  { %2709 = vmatpush1.bf16.msra.mxu0 %v2692_v46 }
 0x1ab   :  { %2726 = vmatprep.subr.bf16.mxu0 %v3004_v36 }
 0x234   :  { %v600_v3 = vpop.f32.mrb[0].mxu0 }
 0x235   :  { %v2496_v47 = vpop.f32.mrb[1].mxu0  ;;  %2350 = vmatmul.mubr.msk.f32.vlgmr.msra.gmra.mrb[0].mxu1 %vm659_vm3, %v600_v3 }
 0x236   :  { %739 = vmatprep.mubr.f32.mxu1 %v3005_v63  ;;  %2681 = vmatpush1.bf16.msra.mxu1 %v2680_v42 }
 0x237   :  { %2683 = vmatprep.subr.bf16.mxu1 %v2682_v9 }
 0x23a   :  { %2685 = vmatpush1.bf16.msra.mxu1 %v2684_v5 }
 0x23b   :  { %2687 = vmatprep.subr.bf16.mxu1 %v2686_v43 }
 0x23e   :  { %2689 = vmatpush1.bf16.msra.mxu1 %v2688_v8 }
 0x23f   :  { %2691 = vmatprep.subr.bf16.mxu1 %v2690_v11 }
 0x242   :  { %2693 = vmatpush1.bf16.msra.mxu1 %v2692_v46 }
 0x243   :  { %2711 = vmatprep.subr.bf16.mxu1 %v2678_v60 }
 0x268   :  { %v605_v48 = vpop.f32.mrb[2].mxu0 }
 0x269   :  { %v2499_v49 = vpop.f32.mrb[3].mxu0  ;;  %2351 = vmatmul.mubr.msk.f32.gmra.mrb[2].mxu1 %vm659_vm3, %v605_v48 }
 0x26a   :  { %745 = vmatprep.mubr.f32.mxu1 %v3005_v63 }
 0x27a   :  { %v610_v50 = vpop.f32.mrb[4].mxu0 }
 0x27b   :  { %v2502_v2 = vpop.f32.mrb[5].mxu0  ;;  %2352 = vmatmul.mubr.msk.f32.gmra.mrb[4].mxu1 %vm659_vm3, %v610_v50 }
 0x27c   :  { %819 = vmatprep.mubr.f32.mxu1 %v3005_v63 }
 0x27f   :  { %820 = vmatmul.mubr.f32.vlgmr.msra.gmra.mrb[6].mxu1 %v3005_v63 }
 0x280   :  { %2713 = vmatpush1.bf16.msra.mxu1 %v2680_v42  ;;  %1009 = vmatprep.mubr.f32.mxu1 %v3005_v63 }
 0x281   :  { %2715 = vmatprep.subr.bf16.mxu1 %v2682_v9 }
 0x284   :  { %2717 = vmatpush1.bf16.msra.mxu1 %v2684_v5 }
 0x285   :  { %2719 = vmatprep.subr.bf16.mxu1 %v2686_v43 }
 0x288   :  { %2721 = vmatpush1.bf16.msra.mxu1 %v2688_v8 }
 0x289   :  { %2723 = vmatprep.subr.bf16.mxu1 %v2690_v11 }
 0x28c   :  { %2725 = vmatpush1.bf16.msra.mxu1 %v2692_v46 }
 0x28d   :  { %2738 = vmatprep.subr.bf16.mxu1 %v3004_v36 }
 0x308   :  { %v735_v51 = vpop.f32.mrb[0].mxu1 }
 0x309   :  { %v737_v52 = vpop.f32.mrb[1].mxu1  ;;  %v736_v0 = vadd.f32 %v735_v51, %v652_v59 }
 0x30a   :  { %v738_v32 = vadd.f32 %v737_v52, %v656_v22  ;;  %v1035_v52 = vld [vmem:[%s3826_s4] sm:$0xff] }
 0x33c   :  { %v741_v54 = vpop.f32.mrb[2].mxu1 }
 0x33d   :  { %v743_v55 = vpop.f32.mrb[3].mxu1  ;;  %v742_v26 = vadd.f32 %v741_v54, %v652_v59  ;;  %v1036_v54 = vld [vmem:[%s3826_s4 + $0x8] sm:$0xff] }
 0x33e   :  { %v744_v39 = vadd.f32 %v743_v55, %v656_v22  ;;  %v1037_v55 = vld [vmem:[%s3826_s4 + $0x10] sm:$0xff]  ;;  %v2727_v58 = vpack.c.bf16 %v1036_v54, %v1035_v52 }
 0x34e   :  { %v747_v62 = vpop.f32.mrb[4].mxu1 }
 0x34f   :  { %v3504_v1 = vpop.f32.mrb[5].mxu1  ;;  %v748_v17 = vadd.f32 %v747_v62, %v652_v59  ;;  %v1038_v59 = vld [vmem:[%s3826_s4 + $0x18] sm:$0xff] }
 0x350   :  { %v750_v50 = vadd.f32 %v3504_v1, %v656_v22  ;;  %v2730_v62 = vpack.c.bf16 %v1038_v59, %v1037_v55  ;;  %v1039_v1 = vld [vmem:[%s3826_s4 + $0x20] sm:$0xff] }
 0x352   :  { %v821_v4 = vpop.f32.mrb[6].mxu1 }
 0x353   :  { %v826_v6 = vadd.f32 %v821_v4, %v736_v0  ;;  %v823_v10 = vpop.f32.mrb[7].mxu1  ;;  %v1040_v0 = vld [vmem:[%s3826_s4 + $0x28] sm:$0xff] }
 0x354   :  { %v833_v29 = vadd.f32 %v823_v10, %v647_v61  ;;  %v1041_v10 = vld [vmem:[%s3826_s4 + $0x30] sm:$0xff] }
 0x355   :  { %v2353_v13 = vmul.f32 -1.442695, %v826_v6  ;;  %v2733_v6 = vpack.c.bf16 %v1040_v0, %v1039_v1 }
 0x357   :  { %2888 = vpow2.f32 %v2353_v13  ;;  %v1042_v13 = vld [vmem:[%s3826_s4 + $0x38] sm:$0xff] }
 0x361   :  { %v2889_v25 = vpop.eup %2888 }
 0x362   :  { %v830_v15 = vadd.f32 1.0, %v2889_v25  ;;  %v2736_v25 = vpack.c.bf16 %v1042_v13, %v1041_v10  ;;  %v1367_v13 = vld [vmem:[%s3826_s4 + $0xc8] sm:$0xff] }
 0x364   :  { %2890 = vrcp.f32 %v830_v15 }
 0x36e   :  { %v2891_v30 = vpop.eup %2890 }
 0x36f   :  { %v834_v14 = vmul.f32 %v2891_v30, %v833_v29  ;;  %v837_v7 = vsub.f32 1.0, %v2891_v30  ;;  %v843_v23 = vmul.f32 0.0, %v2891_v30 }
 0x371   :  { %v835_v33 = vadd.f32 %v834_v14, %v738_v32  ;;  %v1044_v14 = vld [vmem:[%s3826_s4 + $0x40] sm:$0xff] }
 0x373   :  { %2892 = vtanh.f32 %v835_v33  ;;  %v1045_v33 = vld [vmem:[%s3826_s4 + $0x48] sm:$0xff] }
 0x37d   :  { %v2893_v34 = vpop.eup %2892 }
 0x37e   :  { %839 = vrot.lane.b32.xlu0 %v2893_v34, %s3007_s11  ;;  %v2739_v34 = vpack.c.bf16 %v1045_v33, %v1044_v14 }
 0x3f0   :  { %v840_v24 = vpop.permute.xlu0 %839 }
 0x3f1   :  { %v842_v35 = vmul.f32 %v840_v24, %v837_v7  ;;  %v1220_v7 = vld [vmem:[%s3826_s4 + $0x60] sm:$0xff]  ;;  %v1221_v24 = vld [vmem:[%s3826_s4 + $0x68] sm:$0xff] }
 0x3f3   :  { %v844_v37 = vadd.f32 %v843_v23, %v842_v35  ;;  %v2745_v23 = vpack.c.bf16 %v1221_v24, %v1220_v7  ;;  %v1222_v35 = vld [vmem:[%s3826_s4 + $0x70] sm:$0xff] }
 0x3f5   :  { %846 = vrot.lane.b32.xlu1 %v844_v37, %s3007_s11 }
 0x467   :  { %v847_v53 = vpop.permute.xlu1 %846 }
 0x468   :  { %2354 = vmatmul.mubr.msk.f32.vlgmr.msra.gmra.mrb[6].mxu0 %vm659_vm3, %v847_v53 }
 0x469   :  { %2519 = vmatprep.mubr.msk.f32.mxu0 %vm3006_vm4, %v3005_v63  ;;  %2728 = vmatpush3.bf16.msra.mxu0 %v2727_v58 }
 0x46a   :  { %2729 = vmatprep.subr.bf16.mxu0 %v3004_v36 }
 0x46d   :  { %2731 = vmatpush3.bf16.msra.mxu0 %v2730_v62 }
 0x46e   :  { %2732 = vmatprep.subr.bf16.mxu0 %v3004_v36 }
 0x471   :  { %2734 = vmatpush3.bf16.msra.mxu0 %v2733_v6  ;;  %v1366_v6 = vld [vmem:[%s3826_s4 + $0xc0] sm:$0xff] }
 0x472   :  { %2735 = vmatprep.subr.bf16.mxu0 %v3004_v36 }
 0x475   :  { %2737 = vmatpush3.bf16.msra.mxu0 %v2736_v25  ;;  %v1368_v25 = vld [vmem:[%s3826_s4 + $0xd0] sm:$0xff] }
 0x476   :  { %2744 = vmatprep.subr.bf16.mxu0 %v3004_v36 }
 0x53b   :  { %v916_v18 = vpop.f32.mrb[6].mxu0 }
 0x53c   :  { %v921_v28 = vadd.f32 %v916_v18, %v742_v26  ;;  %v918_v60 = vpop.f32.mrb[7].mxu0  ;;  %v1217_v18 = vld [vmem:[%s3826_s4 + $0x80] sm:$0xff] }
 0x53d   :  { %v928_v42 = vadd.f32 %v918_v60, %v647_v61  ;;  %v1219_v60 = vld [vmem:[%s3826_s4 + $0x90] sm:$0xff] }
 0x53e   :  { %v2355_v12 = vmul.f32 -1.442695, %v921_v28  ;;  %v1218_v28 = vld [vmem:[%s3826_s4 + $0x88] sm:$0xff] }
 0x540   :  { %2894 = vpow2.f32 %v2355_v12  ;;  %v1046_v12 = vld [vmem:[%s3826_s4 + $0x50] sm:$0xff] }
 0x54a   :  { %v2895_v41 = vpop.eup %2894 }
 0x54b   :  { %v925_v38 = vadd.f32 1.0, %v2895_v41  ;;  %v1047_v41 = vld [vmem:[%s3826_s4 + $0x58] sm:$0xff] }
 0x54d   :  { %2896 = vrcp.f32 %v925_v38  ;;  %v2742_v38 = vpack.c.bf16 %v1047_v41, %v1046_v12  ;;  %v1315_v41 = vld [vmem:[%s3827_s5 + $0x10] ss:$0 sm:$0xff] }
 0x557   :  { %v2897_v9 = vpop.eup %2896 }
 0x558   :  { %v929_v40 = vmul.f32 %v2897_v9, %v928_v42  ;;  %v932_v5 = vsub.f32 1.0, %v2897_v9  ;;  %v938_v27 = vmul.f32 %v2897_v9, %v844_v37  ;;  %v1223_v37 = vld [vmem:[%s3826_s4 + $0x78] sm:$0xff]  ;;  %v1043_v42 = vld [vmem:[%s3827_s5 + $0x2] ss:$0 sm:$0xff] }
 0x559   :  { %v2748_v26 = vpack.c.bf16 %v1223_v37, %v1222_v35 }
 0x55a   :  { %v930_v21 = vadd.f32 %v929_v40, %v744_v39 }
 0x55c   :  { %2898 = vtanh.f32 %v930_v21  ;;  %v1224_v21 = vld [vmem:[%s3827_s5 + $0x6] ss:$0 sm:$0xff] }
 0x566   :  { %v2899_v20 = vpop.eup %2898 }
 0x567   :  { %934 = vrot.lane.b32.xlu0 %v2899_v20, %s3007_s11 }
 0x5d9   :  { %v935_v43 = vpop.permute.xlu0 %934 }
 0x5da   :  { %v937_v31 = vmul.f32 %v935_v43, %v932_v5 }
 0x5dc   :  { %v939_v8 = vadd.f32 %v938_v27, %v937_v31 }
 0x5de   :  { %941 = vrot.lane.b32.xlu1 %v939_v8, %s3007_s11 }
 0x650   :  { %v942_v16 = vpop.permute.xlu1 %941 }
 0x651   :  { %2356 = vmatmul.mubr.msk.f32.vlgmr.msra.gmra.mrb[8].mxu1 %vm659_vm3, %v942_v16 }
 0x652   :  { %2530 = vmatprep.mubr.msk.f32.mxu1 %vm3006_vm4, %v3005_v63  ;;  %2740 = vmatpush3.bf16.msra.mxu1 %v2739_v34 }
 0x653   :  { %2741 = vmatprep.subr.bf16.mxu1 %v3004_v36 }
 0x656   :  { %2743 = vmatpush3.bf16.msra.mxu1 %v2742_v38 }
 0x657   :  { %2750 = vmatprep.subr.bf16.mxu1 %v3004_v36 }
 0x724   :  { %v1011_v11 = vpop.f32.mrb[8].mxu1 }
 0x725   :  { %v1016_v44 = vadd.f32 %v1011_v11, %v748_v17  ;;  %v1013_v45 = vpop.f32.mrb[9].mxu1 }
 0x726   :  { %v1023_v48 = vadd.f32 %v1013_v45, %v647_v61 }
 0x727   :  { %v2357_v46 = vmul.f32 -1.442695, %v1016_v44 }
 0x729   :  { %2900 = vpow2.f32 %v2357_v46 }
 0x733   :  { %v2901_v3 = vpop.eup %2900 }
 0x734   :  { %v1020_v47 = vadd.f32 1.0, %v2901_v3 }
 0x736   :  { %2902 = vrcp.f32 %v1020_v47 }
 0x740   :  { %v2903_v49 = vpop.eup %2902 }
 0x741   :  { %v1024_v2 = vmul.f32 %v2903_v49, %v1023_v48  ;;  %v1027_v15 = vsub.f32 1.0, %v2903_v49  ;;  %v1033_v22 = vmul.f32 %v2903_v49, %v939_v8  ;;  %v1048_v49 = vld [vmem:[%s3827_s5 + $0x3] ss:$0 sm:$0xff] }
 0x743   :  { %v1025_v51 = vadd.f32 %v1024_v2, %v750_v50 }
 0x745   :  { %2904 = vtanh.f32 %v1025_v51 }
 0x74f   :  { %v2905_v4 = vpop.eup %2904 }
 0x750   :  { %1029 = vrot.lane.b32.xlu0 %v2905_v4, %s3007_s11  ;;  %v1365_v4 = vld [vmem:[%s3826_s4 + $0xb8] sm:$0xff] }
 0x751   :  { %v2757_v10 = vpack.c.bf16 %v1366_v6, %v1365_v4  ;;  %v1728_v4 = vsub.s32 2, %v3496_v56  ;;  %v1820_v6 = vsub.s32 3, %v3496_v56 }
 0x7c2   :  { %v1030_v61 = vpop.permute.xlu0 %1029 }
 0x7c3   :  { %v1032_v29 = vmul.f32 %v1030_v61, %v1027_v15  ;;  %v2760_v15 = vpack.c.bf16 %v1368_v25, %v1367_v13  ;;  %v2004_v13 = vsub.s32 5, %v3496_v56  ;;  %v2096_v25 = vsub.s32 6, %v3496_v56 }
 0x7c5   :  { %v1034_v30 = vadd.f32 %v1033_v22, %v1032_v29 }
 0x7c7   :  { %v1049_v32 = vmax.f32 %v1034_v30, 0.0 }
 0x7c9   :  { %1051 = vrot.lane.b32.xlu1 %v1049_v32, %s3007_s11 }
 0x83b   :  { %v1052_v53 = vpop.permute.xlu1 %1051 }
 0x83c   :  { %2520 = vmatmul.mubr.msk.f32.vlgmr.msra.gmra.mrb[8].mxu0 %vm659_vm3, %v1052_v53 }
 0x83d   :  { %2746 = vmatpush3.bf16.msra.mxu0 %v2745_v23  ;;  %2541 = vmatprep.mubr.msk.f32.mxu0 %vm3006_vm4, %v3005_v63 }
 0x83e   :  { %2747 = vmatprep.subr.bf16.mxu0 %v3004_v36 }
 0x841   :  { %2749 = vmatpush3.bf16.msra.mxu0 %v2748_v26 }
 0x842   :  { %2756 = vmatprep.subr.bf16.mxu0 %v3004_v36 }
 0x844   :  { %2542 = vmatmul.mubr.msk.f32.vlgmr.msra.gmra.mrb[10].mxu0 %vm1125_vm5, %v1217_v18 }
 0x845   :  { %2544 = vmatprep.mubr.msk.f32.mxu0 %vm3006_vm4, %v3005_v63  ;;  %2758 = vmatpush3.bf16.msra.mxu0 %v2757_v10  ;;  %v1912_v10 = vsub.s32 4, %v3496_v56 }
 0x846   :  { %2759 = vmatprep.subr.bf16.mxu0 %v3004_v36 }
 0x848   :  { %2545 = vmatmul.mubr.msk.f32.gmra.mrb[12].mxu0 %vm1125_vm5, %v1218_v28 }
 0x849   :  { %2547 = vmatprep.mubr.msk.f32.mxu0 %vm3006_vm4, %v3005_v63  ;;  %2761 = vmatpush3.bf16.msra.mxu0 %v2760_v15  ;;  %v2188_v15 = vsub.s32 7, %v3496_v56 }
 0x84a   :  { %2766 = vmatprep.subr.bf16.mxu0 %v3004_v36 }
 0x84c   :  { %2548 = vmatmul.mubr.msk.f32.gmra.mrb[14].mxu0 %vm1125_vm5, %v1219_v60  ;;  %v1314_v60 = vld [vmem:[%s3827_s5 + $0x7] ss:$0 sm:$0xff] }
 0x84d   :  { %2569 = vmatprep.mubr.msk.f32.mxu0 %vm3006_vm4, %v3005_v63 }
 0x90f   :  { %v1121_v9 = vpop.f32.mrb[8].mxu0 }
 0x910   :  { %v1122_v39 = vadd.f32 %v1121_v9, %v1043_v42  ;;  %v2521_v40 = vpop.f32.mrb[9].mxu0 }
 0x912   :  { %2531 = vmatmul.mubr.msk.f32.vlgmr.msra.gmra.mrb[10].mxu1 %vm1125_vm5, %v1122_v39 }
 0x913   :  { %2558 = vmatprep.mubr.msk.f32.mxu1 %vm3006_vm4, %v3005_v63 }
 0x917   :  { %v1300_v20 = vpop.f32.mrb[10].mxu0 }
 0x918   :  { %v1301_v5 = vadd.f32 %v1300_v20, %v1224_v21  ;;  %v2543_v43 = vpop.f32.mrb[11].mxu0  ;;  %v1361_v20 = vld [vmem:[%s3826_s4 + $0x98] sm:$0xff] }
 0x91a   :  { %v1316_v27 = vsel %vm1125_vm5, %v1301_v5, 0.0 }
 0x91b   :  { %1317 = vadd.xlane.f32.xlu0 %v1316_v27  ;;  %v1305_v31 = vpop.f32.mrb[12].mxu0  ;;  %v1363_v27 = vld [vmem:[%s3826_s4 + $0xa8] sm:$0xff] }
 0x91c   :  { %v1306_v8 = vadd.f32 %v1305_v31, %v1224_v21  ;;  %v2546_v16 = vpop.f32.mrb[13].mxu0  ;;  %v1364_v31 = vld [vmem:[%s3826_s4 + $0xb0] sm:$0xff] }
 0x91e   :  { %v1319_v17 = vsel %vm1125_vm5, %v1306_v8, 0.0 }
 0x91f   :  { %1320 = vadd.xlane.f32.xlu0 %v1319_v17  ;;  %v1310_v11 = vpop.f32.mrb[14].mxu0 }
 0x920   :  { %v1311_v44 = vadd.f32 %v1310_v11, %v1224_v21  ;;  %v2549_v45 = vpop.f32.mrb[15].mxu0 }
 0x922   :  { %v1322_v46 = vsel %vm1125_vm5, %v1311_v44, 0.0 }
 0x923   :  { %1323 = vadd.xlane.f32.xlu0 %v1322_v46 }
 0x9a8   :  { %v1318_v3 = vpop.xlane.xlu0 %1317 }
 0x9a9   :  { %v1325_v47 = vmul.f32 0.03125, %v1318_v3 }
 0x9ab   :  { %v1328_v50 = vsub.f32 %v1301_v5, %v1325_v47  ;;  %v1362_v5 = vld [vmem:[%s3826_s4 + $0xa0] sm:$0xff] }
 0x9ac   :  { %v1321_v48 = vpop.xlane.xlu0 %1320  ;;  %v2751_v43 = vpack.c.bf16 %v1362_v5, %v1361_v20  ;;  %v1199_v47 = vld [vmem:[%s3827_s5 + $0x4] ss:$0 sm:$0xff] }
 0x9ad   :  { %v1326_v2 = vmul.f32 0.03125, %v1321_v48  ;;  %v1331_v59 = vmul.f32 %v1328_v50, %v1328_v50 }
 0x9ae   :  { %2752 = vmatpush3.bf16.msra.mxu1 %v2751_v43 }
 0x9af   :  { %v1329_v55 = vsub.f32 %v1306_v8, %v1326_v2  ;;  %v1334_v62 = vsel %vm1125_vm5, %v1331_v59, 0.0  ;;  %2753 = vmatprep.subr.bf16.mxu1 %v3004_v36  ;;  %v2754_v8 = vpack.c.bf16 %v1364_v31, %v1363_v27 }
 0x9b0   :  { %v1324_v61 = vpop.xlane.xlu0 %1323 }
 0x9b1   :  { %v1332_v1 = vmul.f32 %v1329_v55, %v1329_v55  ;;  %v1327_v22 = vmul.f32 0.03125, %v1324_v61 }
 0x9b2   :  { %2755 = vmatpush3.bf16.msra.mxu1 %v2754_v8 }
 0x9b3   :  { %v1337_v0 = vsel %vm1125_vm5, %v1332_v1, 0.0  ;;  %v1330_v32 = vsub.f32 %v1311_v44, %v1327_v22  ;;  %2762 = vmatprep.subr.bf16.mxu1 %v3004_v36 }
 0x9b5   :  { %v1333_v35 = vmul.f32 %v1330_v32, %v1330_v32 }
 0x9b7   :  { %v1340_v18 = vsel %vm1125_vm5, %v1333_v35, 0.0 }
 0x9e5   :  { %v1195_v51 = vpop.f32.mrb[10].mxu1 }
 0x9e6   :  { %v1196_v52 = vadd.f32 %v1195_v51, %v1048_v49  ;;  %v2532_v54 = vpop.f32.mrb[11].mxu1  ;;  %v1200_v49 = vld [vmem:[%s3827_s5 + $0x5] ss:$0 sm:$0xff] }
 0x9e8   :  { %v1201_v58 = vsel %vm1125_vm5, %v1196_v52, 0.0 }
 0x9e9   :  { %1202 = vadd.xlane.f32.xlu1 %v1201_v58 }
 0x9ed   :  { %1335 = vadd.xlane.f32.xlu1 %v1334_v62 }
 0x9f1   :  { %1338 = vadd.xlane.f32.xlu1 %v1337_v0  ;;  %v1371_v0 = vld [vmem:[%s3827_s5 + $0x12] ss:$0 sm:$0xff] }
 0xa02   :  { %1549 = vperm.xlu1 %2886, %v1371_v0  }
 0xa76   :  { %v1203_v29 = vpop.xlane.xlu1 %1202 }
 0xa77   :  { %v1205_v30 = vmul.f32 0.03125, %v1203_v29 }
 0xa79   :  { %v1206_v14 = vsub.f32 %v1196_v52, %v1205_v30 }
 0xa7a   :  { %v1336_v33 = vpop.xlane.xlu1 %1335 }
 0xa7b   :  { %v1343_v34 = vmul.f32 0.03125, %v1336_v33  ;;  %v1207_v7 = vmul.f32 %v1206_v14, %v1206_v14 }
 0xa7d   :  { %v1346_v24 = vadd.f32 1e-05, %v1343_v34  ;;  %v1208_v23 = vsel %vm1125_vm5, %v1207_v7, 0.0 }
 0xa7e   :  { %v1339_v37 = vpop.xlane.xlu1 %1338  ;;  %1209 = vadd.xlane.f32.xlu0 %v1208_v23 }
 0xa7f   :  { %2906 = vrsqrt.f32 %v1346_v24  ;;  %v1344_v53 = vmul.f32 0.03125, %v1339_v37 }
 0xa81   :  { %v1347_v26 = vadd.f32 1e-05, %v1344_v53 }
 0xa82   :  { %1341 = vadd.xlane.f32.xlu0 %v1340_v18 }
 0xa83   :  { %2908 = vrsqrt.f32 %v1347_v26 }
 0xa89   :  { %v2907_v28 = vpop.eup %2906 }
 0xa8a   :  { %v1352_v12 = vmul.f32 %v2907_v28, %v1328_v50 }
 0xa8c   :  { %v1355_v38 = vmul.f32 %v1352_v12, %v1314_v60 }
 0xa8d   :  { %v2909_v42 = vpop.eup %2908 }
 0xa8e   :  { %v1358_v9 = vadd.f32 %v1355_v38, %v1315_v41  ;;  %v1353_v39 = vmul.f32 %v2909_v42, %v1329_v55 }
 0xa90   :  { %2570 = vmatmul.mubr.msk.f32.vlgmr.msra.gmra.mrb[16].mxu0 %vm1125_vm5, %v1358_v9  ;;  %v1356_v40 = vmul.f32 %v1353_v39, %v1314_v60 }
 0xa91   :  { %2572 = vmatprep.mubr.msk.f32.mxu0 %vm3006_vm4, %v3005_v63 }
 0xa92   :  { %v1359_v21 = vadd.f32 %v1356_v40, %v1315_v41 }
 0xa94   :  { %2573 = vmatmul.mubr.msk.f32.gmra.mrb[18].mxu0 %vm1125_vm5, %v1359_v21 }
 0xa95   :  { %2575 = vmatprep.mubr.msk.f32.mxu0 %vm3006_vm4, %v3005_v63 }
 0xb0b   :  { %v1210_v16 = vpop.xlane.xlu0 %1209 }
 0xb0c   :  { %v1211_v17 = vmul.f32 0.03125, %v1210_v16 }
 0xb0e   :  { %v1212_v11 = vadd.f32 1e-05, %v1211_v17  ;;  %v3702_v17 = vld [vmem:[%s3827_s5 + $0x11] ss:$0 sm:$0xff] }
 0xb0f   :  { %v1342_v44 = vpop.xlane.xlu0 %1341 }
 0xb10   :  { %2910 = vrsqrt.f32 %v1212_v11  ;;  %v1345_v45 = vmul.f32 0.03125, %v1342_v44 }
 0xb12   :  { %v1348_v46 = vadd.f32 1e-05, %v1345_v45 }
 0xb14   :  { %2912 = vrsqrt.f32 %v1348_v46 }
 0xb1a   :  { %v2911_v3 = vpop.eup %2910 }
 0xb1b   :  { %v1214_v48 = vmul.f32 %v2911_v3, %v1206_v14 }
 0xb1d   :  { %v1215_v50 = vmul.f32 %v1214_v48, %v1199_v47 }
 0xb1e   :  { %v2913_v2 = vpop.eup %2912 }
 0xb1f   :  { %v1216_v51 = vadd.f32 %v1215_v50, %v1200_v49  ;;  %v1354_v52 = vmul.f32 %v2913_v2, %v1330_v32 }
 0xb21   :  { %2559 = vmatmul.mubr.msk.f32.vlgmr.msra.gmra.mrb[12].mxu1 %vm1125_vm5, %v1216_v51  ;;  %v1357_v54 = vmul.f32 %v1354_v52, %v1314_v60 }
 0xb22   :  { %2584 = vmatprep.mubr.msk.f32.mxu1 %vm3006_vm4, %v3005_v63 }
 0xb23   :  { %v1360_v55 = vadd.f32 %v1357_v54, %v1315_v41 }
 0xb25   :  { %2576 = vmatmul.mubr.msk.f32.gmra.mrb[20].mxu0 %vm1125_vm5, %v1360_v55 }
 0xb26   :  { %2593 = vmatprep.mubr.msk.f32.mxu0 %vm3006_vm4, %v3005_v63 }
 0xb63   :  { %v1520_v58 = vpop.f32.mrb[16].mxu0 }
 0xb64   :  { %v2571_v59 = vpop.f32.mrb[17].mxu0 }
 0xb67   :  { %v1525_v62 = vpop.f32.mrb[18].mxu0 }
 0xb68   :  { %v2574_v1 = vpop.f32.mrb[19].mxu0 }
 0xbf4   :  { %v1441_v61 = vpop.f32.mrb[12].mxu1 }
 0xbf5   :  { %v1537_v22 = vrot.slane %v1441_v61, %v651_v57  ;;  %v1637_v29 = vrot.slane %v1441_v61, %v655_v19  ;;  %v1729_v30 = vrot.slane %v1441_v61, %v1728_v4  ;;  %v1821_v32 = vrot.slane %v1441_v61, %v1820_v6  ;;  %v2560_v14 = vpop.f32.mrb[13].mxu1 }
 0xbf6   :  { %v1913_v33 = vrot.slane %v1441_v61, %v1912_v10  ;;  %v2005_v34 = vrot.slane %v1441_v61, %v2004_v13  ;;  %v2097_v7 = vrot.slane %v1441_v61, %v2096_v25  ;;  %v2189_v24 = vrot.slane %v1441_v61, %v2188_v15 }
 0xbf7   :  { %v1538_v23 = vadd.f32 %v1537_v22, %v1520_v58  ;;  %v1539_v35 = vadd.f32 %v1537_v22, %v1525_v62  ;;  %v1638_v37 = vadd.f32 %v1637_v29, %v1520_v58  ;;  %v1639_v53 = vadd.f32 %v1637_v29, %v1525_v62 }
 0xbf8   :  { %v1730_v26 = vadd.f32 %v1729_v30, %v1520_v58  ;;  %v1731_v18 = vadd.f32 %v1729_v30, %v1525_v62  ;;  %v1822_v28 = vadd.f32 %v1821_v32, %v1520_v58  ;;  %v1823_v60 = vadd.f32 %v1821_v32, %v1525_v62  ;;  %v1530_v12 = vpop.f32.mrb[20].mxu0 }
 0xbf9   :  { %v1914_v57 = vadd.f32 %v1913_v33, %v1520_v58  ;;  %v1915_v41 = vadd.f32 %v1913_v33, %v1525_v62  ;;  %v2006_v56 = vadd.f32 %v2005_v34, %v1520_v58  ;;  %v2007_v19 = vadd.f32 %v2005_v34, %v1525_v62  ;;  %v2577_v38 = vpop.f32.mrb[21].mxu0 }
 0xbfa   :  { %v2098_v42 = vadd.f32 %v2097_v7, %v1520_v58  ;;  %v2099_v9 = vadd.f32 %v2097_v7, %v1525_v62  ;;  %v2190_v39 = vadd.f32 %v2189_v24, %v1520_v58  ;;  %v2191_v40 = vadd.f32 %v2189_v24, %v1525_v62 }
 0xbfb   :  { %v1540_v21 = vadd.f32 %v1537_v22, %v1530_v12  ;;  %v1640_v20 = vadd.f32 %v1637_v29, %v1530_v12  ;;  %v3687_v5 = vadd.f32 %v1729_v30, %v1530_v12  ;;  %v3689_v43 = vadd.f32 %v1821_v32, %v1530_v12 }
 0xbfc   :  { %v3691_v27 = vadd.f32 %v1913_v33, %v1530_v12  ;;  %v3693_v31 = vadd.f32 %v2005_v34, %v1530_v12  ;;  %v3695_v8 = vadd.f32 %v2097_v7, %v1530_v12  ;;  %v3697_v16 = vadd.f32 %v2189_v24, %v1530_v12 }
 0xbfd   :  { %v1543_v11 = vadd.f32 %v1540_v21, %v3702_v17  ;;  %v1643_v44 = vadd.f32 %v1640_v20, %v3702_v17  ;;  %v1541_v45 = vadd.f32 %v1538_v23, %v3702_v17  ;;  %v1542_v46 = vadd.f32 %v1539_v35, %v3702_v17 }
 0xbfe   :  { %v1641_v3 = vadd.f32 %v1638_v37, %v3702_v17  ;;  %v1642_v47 = vadd.f32 %v1639_v53, %v3702_v17  ;;  %v1733_v48 = vadd.f32 %v1730_v26, %v3702_v17  ;;  %v1734_v49 = vadd.f32 %v1731_v18, %v3702_v17 }
 0xbff   :  { %2914 = vtanh.f32 %v1543_v11  ;;  %v1825_v50 = vadd.f32 %v1822_v28, %v3702_v17  ;;  %v1826_v2 = vadd.f32 %v1823_v60, %v3702_v17  ;;  %v1917_v51 = vadd.f32 %v1914_v57, %v3702_v17  ;;  %v1370_v28 = vld [vmem:[%s3826_s4 + $0xd8] sm:$0x1] }
 0xc00   :  { %2916 = vtanh.f32 %v1643_v44  ;;  %v1918_v52 = vadd.f32 %v1915_v41, %v3702_v17  ;;  %v2009_v54 = vadd.f32 %v2006_v56, %v3702_v17  ;;  %v2010_v55 = vadd.f32 %v2007_v19, %v3702_v17 }
 0xc01   :  { %2918 = vtanh.f32 %v1541_v45  ;;  %v2101_v59 = vadd.f32 %v2098_v42, %v3702_v17  ;;  %v2102_v1 = vadd.f32 %v2099_v9, %v3702_v17  ;;  %v2193_v4 = vadd.f32 %v2190_v39, %v3702_v17 }
 0xc02   :  { %2920 = vtanh.f32 %v1542_v46  ;;  %v2194_v13 = vadd.f32 %v2191_v40, %v3702_v17  ;;  %v1735_v23 = vadd.f32 %v3687_v5, %v3702_v17  ;;  %v1827_v26 = vadd.f32 %v3689_v43, %v3702_v17 }
 0xc03   :  { %2922 = vtanh.f32 %v1641_v3  ;;  %v1919_v38 = vadd.f32 %v3691_v27, %v3702_v17  ;;  %v2011_v9 = vadd.f32 %v3693_v31, %v3702_v17  ;;  %v2103_v40 = vadd.f32 %v3695_v8, %v3702_v17  ;;  %v1550_v27 = vpop.permute.xlu1 %1549 }
 0xc04   :  { %2924 = vtanh.f32 %v1642_v47  ;;  %v2195_v20 = vadd.f32 %v3697_v16, %v3702_v17 }
 0xc05   :  { %2926 = vtanh.f32 %v1733_v48 }
 0xc06   :  { %2928 = vtanh.f32 %v1734_v49 }
 0xc07   :  { %2930 = vtanh.f32 %v1825_v50 }
 0xc08   :  { %2932 = vtanh.f32 %v1826_v2 }
 0xc09   :  { %v2915_v58 = vpop.eup %2914  ;;  %2934 = vtanh.f32 %v1917_v51 }
 0xc0a   :  { %v2917_v62 = vpop.eup %2916  ;;  %2936 = vtanh.f32 %v1918_v52 }
 0xc0b   :  { %v2919_v0 = vpop.eup %2918  ;;  %2938 = vtanh.f32 %v2009_v54 }
 0xc0c   :  { %v2921_v6 = vpop.eup %2920  ;;  %2940 = vtanh.f32 %v2010_v55 }
 0xc0d   :  { %v2923_v25 = vpop.eup %2922  ;;  %v2763_v15 = vpack.c.bf16 %v2921_v6, %v2919_v0  ;;  %2942 = vtanh.f32 %v2101_v59 }
 0xc0e   :  { %v2925_v61 = vpop.eup %2924  ;;  %2944 = vtanh.f32 %v2102_v1 }
 0xc0f   :  { %v2927_v22 = vpop.eup %2926  ;;  %2765 = vmatpush3.bf16.xpose.msk.msra.mxu1 %vm3723_vm6, %v2763_v15  ;;  %v2767_v29 = vpack.c.bf16 %v2925_v61, %v2923_v25  ;;  %2946 = vtanh.f32 %v2193_v4 }
 0xc10   :  { %v2929_v30 = vpop.eup %2928  ;;  %2582 = vmatprep.subr.mxu1 %v3005_v63  ;;  %2948 = vtanh.f32 %v2194_v13 }
 0xc11   :  { %v2931_v32 = vpop.eup %2930  ;;  %2769 = vmatpush3.bf16.xpose.msk.msra.mxu0 %vm3723_vm6, %v2767_v29  ;;  %v2771_v14 = vpack.c.bf16 %v2929_v30, %v2927_v22  ;;  %2950 = vtanh.f32 %v1735_v23 }
 0xc12   :  { %v2933_v33 = vpop.eup %2932  ;;  %2591 = vmatprep.subr.mxu0 %v3005_v63  ;;  %2952 = vtanh.f32 %v1827_v26 }
 0xc13   :  { %v2935_v34 = vpop.eup %2934  ;;  %v2775_v7 = vpack.c.bf16 %v2933_v33, %v2931_v32  ;;  %2954 = vtanh.f32 %v1919_v38 }
 0xc14   :  { %v2937_v24 = vpop.eup %2936  ;;  %2956 = vtanh.f32 %v2011_v9 }
 0xc15   :  { %v2939_v35 = vpop.eup %2938  ;;  %v2779_v37 = vpack.c.bf16 %v2937_v24, %v2935_v34  ;;  %2958 = vtanh.f32 %v2103_v40 }
 0xc16   :  { %v2941_v53 = vpop.eup %2940  ;;  %2960 = vtanh.f32 %v2195_v20 }
 0xc17   :  { %v2943_v18 = vpop.eup %2942  ;;  %2583 = vmatpush3.xpose.msk.msra.mxu1 %vm659_vm3, %v2915_v58  ;;  %v2783_v60 = vpack.c.bf16 %v2941_v53, %v2939_v35 }
 0xc18   :  { %v2945_v12 = vpop.eup %2944  ;;  %2770 = vmatprep.subr.bf16.mxu1 %v3004_v36 }
 0xc19   :  { %v2947_v57 = vpop.eup %2946  ;;  %2592 = vmatpush3.xpose.msk.msra.mxu0 %vm659_vm3, %v2917_v62  ;;  %v2787_v41 = vpack.c.bf16 %v2945_v12, %v2943_v18  ;;  %v2313_v12 = vld [vmem:[%s3827_s5 + $0x13] ss:$0 sm:$0xff] }
 0xc1a   :  { %v2949_v56 = vpop.eup %2948  ;;  %2774 = vmatprep.subr.bf16.mxu0 %v3004_v36  ;;  %2585 = vmatmul.mubr.msk.f32.vlgmr.msra.gmra.mrb[14].mxu1 %vm659_vm3, %v1370_v28 }
 0xc1b   :  { %2773 = vmatpush3.bf16.xpose.msk.msra.mxu1 %vm3723_vm6, %v2771_v14  ;;  %2602 = vmatprep.mubr.msk.f32.mxu1 %vm3006_vm4, %v3005_v63  ;;  %v2791_v19 = vpack.c.bf16 %v2949_v56, %v2947_v57  ;;  %v2951_v42 = vpop.eup %2950 }
 0xc1c   :  { %2594 = vmatmul.mubr.msk.f32.vlgmr.msra.gmra.mrb[22].mxu0 %vm659_vm3, %v1370_v28  ;;  %2600 = vmatprep.subr.mxu1 %v3005_v63  ;;  %v2953_v39 = vpop.eup %2952 }
 0xc1d   :  { %2777 = vmatpush3.bf16.xpose.msk.msra.mxu0 %vm3723_vm6, %v2775_v7  ;;  %2611 = vmatprep.mubr.msk.f32.mxu0 %vm3006_vm4, %v3005_v63  ;;  %v2955_v21 = vpop.eup %2954 }
 0xc1e   :  { %2609 = vmatprep.subr.mxu0 %v3005_v63  ;;  %v2957_v5 = vpop.eup %2956 }
 0xc1f   :  { %v2959_v43 = vpop.eup %2958 }
 0xc23   :  { %2601 = vmatpush3.xpose.msk.msra.mxu1 %vm659_vm3, %v2951_v42 }
 0xc24   :  { %2778 = vmatprep.subr.bf16.mxu1 %v3004_v36 }
 0xc25   :  { %2610 = vmatpush3.xpose.msk.msra.mxu0 %vm659_vm3, %v2953_v39 }
 0xc26   :  { %2603 = vmatmul.mubr.msk.f32.vlgmr.msra.gmra.mrb[16].mxu1 %vm659_vm3, %v1370_v28  ;;  %2782 = vmatprep.subr.bf16.mxu0 %v3004_v36 }
 0xc27   :  { %2781 = vmatpush3.bf16.xpose.msk.msra.mxu1 %vm3723_vm6, %v2779_v37  ;;  %2620 = vmatprep.mubr.msk.f32.mxu1 %vm3006_vm4, %v3005_v63 }
 0xc28   :  { %2612 = vmatmul.mubr.msk.f32.vlgmr.msra.gmra.mrb[24].mxu0 %vm659_vm3, %v1370_v28  ;;  %2618 = vmatprep.subr.mxu1 %v3005_v63 }
 0xc29   :  { %2785 = vmatpush3.bf16.xpose.msk.msra.mxu0 %vm3723_vm6, %v2783_v60  ;;  %2629 = vmatprep.mubr.msk.f32.mxu0 %vm3006_vm4, %v3005_v63 }
 0xc2a   :  { %2627 = vmatprep.subr.mxu0 %v3005_v63 }
 0xc2f   :  { %2619 = vmatpush3.xpose.msk.msra.mxu1 %vm659_vm3, %v2955_v21 }
 0xc30   :  { %2786 = vmatprep.subr.bf16.mxu1 %v3004_v36 }
 0xc31   :  { %2628 = vmatpush3.xpose.msk.msra.mxu0 %vm659_vm3, %v2957_v5 }
 0xc32   :  { %2621 = vmatmul.mubr.msk.f32.vlgmr.msra.gmra.mrb[18].mxu1 %vm659_vm3, %v1370_v28  ;;  %2790 = vmatprep.subr.bf16.mxu0 %v3004_v36  ;;  %v2961_v36 = vpop.eup %2960 }
 0xc33   :  { %2789 = vmatpush3.bf16.xpose.msk.msra.mxu1 %vm3723_vm6, %v2787_v41  ;;  %2638 = vmatprep.mubr.msk.f32.mxu1 %vm3006_vm4, %v3005_v63  ;;  %v2314_v41 = vld [vmem:[%s3827_s5 + $0x14] ss:$0 sm:$0xff] }
 0xc34   :  { %2630 = vmatmul.mubr.msk.f32.vlgmr.msra.gmra.mrb[26].mxu0 %vm659_vm3, %v1370_v28  ;;  %2636 = vmatprep.subr.mxu1 %v3005_v63 }
 0xc35   :  { %2793 = vmatpush3.bf16.xpose.msk.msra.mxu0 %vm3723_vm6, %v2791_v19  ;;  %2647 = vmatprep.mubr.msk.f32.mxu0 %vm3006_vm4, %v3005_v63  ;;  %vm2299_vm4 = vcmask 1040384  }
 0xc36   :  { %2645 = vmatprep.subr.mxu0 %v3005_v63 }
 0xc3b   :  { %2637 = vmatpush3.xpose.msk.msra.mxu1 %vm659_vm3, %v2959_v43 }
 0xc3d   :  { %2646 = vmatpush3.xpose.msk.msra.mxu0 %vm659_vm3, %v2961_v36 }
 0xc3e   :  { %2639 = vmatmul.mubr.msk.f32.vlgmr.msra.gmra.mrb[20].mxu1 %vm659_vm3, %v1370_v28 }
 0xc40   :  { %2648 = vmatmul.mubr.msk.f32.vlgmr.msra.gmra.mrb[28].mxu0 %vm659_vm3, %v1370_v28 }
 0xced   :  { %v1630_v31 = vpop.f32.mrb[14].mxu1 }
 0xcee   :  { %v2586_v8 = vpop.f32.mrb[15].mxu1  ;;  %v1631_v11 = vadd.f32 %v1630_v31, %v1550_v27 }
 0xcef   :  { %v1722_v16 = vpop.f32.mrb[22].mxu0 }
 0xcf0   :  { %v1723_v17 = vadd.f32 %v1722_v16, %v1550_v27  ;;  %v2595_v44 = vpop.f32.mrb[23].mxu0 }
 0xcf2   :  { %v2279_v45 = vrot.slane %v1723_v17, 7 }
 0xcf4   :  { %v2300_v63 = vsel %vm2299_vm4, %v1631_v11, %v2279_v45 }
 0xcf9   :  { %v1814_v46 = vpop.f32.mrb[16].mxu1 }
 0xcfa   :  { %v1815_v3 = vadd.f32 %v1814_v46, %v1550_v27  ;;  %v2604_v47 = vpop.f32.mrb[17].mxu1 }
 0xcfb   :  { %v1906_v48 = vpop.f32.mrb[24].mxu0 }
 0xcfc   :  { %v2282_v49 = vrot.slane %v1815_v3, 6  ;;  %v1907_v50 = vadd.f32 %v1906_v48, %v1550_v27  ;;  %v2613_v2 = vpop.f32.mrb[25].mxu0 }
 0xcfe   :  { %v2302_v51 = vsel %vm2301_vm7, %v2300_v63, %v2282_v49  ;;  %v2285_v52 = vrot.slane %v1907_v50, 5 }
 0xd00   :  { %v2304_v54 = vsel %vm2303_vm8, %v2302_v51, %v2285_v52 }
 0xd05   :  { %v1998_v55 = vpop.f32.mrb[18].mxu1 }
 0xd06   :  { %v1999_v58 = vadd.f32 %v1998_v55, %v1550_v27  ;;  %v2622_v59 = vpop.f32.mrb[19].mxu1 }
 0xd07   :  { %v2090_v62 = vpop.f32.mrb[26].mxu0 }
 0xd08   :  { %v2288_v1 = vrot.slane %v1999_v58, 4  ;;  %v2091_v0 = vadd.f32 %v2090_v62, %v1550_v27  ;;  %v2631_v4 = vpop.f32.mrb[27].mxu0 }
 0xd0a   :  { %v2306_v6 = vsel %vm2305_vm9, %v2304_v54, %v2288_v1  ;;  %v2291_v10 = vrot.slane %v2091_v0, 3 }
 0xd0c   :  { %v2308_v13 = vsel %vm2307_vm10, %v2306_v6, %v2291_v10 }
 0xd11   :  { %v2182_v25 = vpop.f32.mrb[20].mxu1 }
 0xd12   :  { %v2183_v15 = vadd.f32 %v2182_v25, %v1550_v27  ;;  %v2640_v61 = vpop.f32.mrb[21].mxu1 }
 0xd13   :  { %v2274_v22 = vpop.f32.mrb[28].mxu0 }
 0xd14   :  { %v2294_v29 = vrot.slane %v2183_v15, 2  ;;  %v2275_v30 = vadd.f32 %v2274_v22, %v1550_v27  ;;  %v2649_v32 = vpop.f32.mrb[29].mxu0 }
 0xd16   :  { %v2297_v14 = vrot.slane %v2275_v30, 1  ;;  %v2310_v33 = vsel %vm2309_vm11, %v2308_v13, %v2294_v29 }
 0xd18   :  { %v2312_v34 = vsel %vm2311_vm12, %v2310_v33, %v2297_v14 }
 0xd19   :  { %v2316_v7 = vsel %vm2315_vm13, %v2312_v34, 0.0 }
 0xd1a   :  { %2317 = vadd.xlane.f32.xlu0 %v2316_v7 }
 0xda7   :  { %v2318_v24 = vpop.xlane.xlu0 %2317 }
 0xda8   :  { %v2320_v23 = vmul.f32 0.041666668, %v2318_v24 }
 0xdaa   :  { %v2321_v35 = vsub.f32 %v2312_v34, %v2320_v23 }
 0xdac   :  { %v2322_v37 = vmul.f32 %v2321_v35, %v2321_v35 }
 0xdae   :  { %v2323_v53 = vsel %vm2315_vm13, %v2322_v37, 0.0 }
 0xdaf   :  { %2324 = vadd.xlane.f32.xlu0 %v2323_v53 }
 0xe3c   :  { %v2325_v26 = vpop.xlane.xlu0 %2324 }
 0xe3d   :  { %v2326_v18 = vmul.f32 0.041666668, %v2325_v26 }
 0xe3f   :  { %v2327_v28 = vadd.f32 1e-05, %v2326_v18 }
 0xe41   :  { %2962 = vrsqrt.f32 %v2327_v28 }
 0xe4b   :  { %v2963_v60 = vpop.eup %2962 }
 0xe4c   :  { %v2329_v57 = vmul.f32 %v2963_v60, %v2321_v35 }
 0xe4e   :  { %v2330_v56 = vmul.f32 %v2329_v57, %v2313_v12 }
 0xe50   :  { %v2331_v19 = vadd.f32 %v2330_v56, %v2314_v41 }
 0xe52   :  { %2332 = vst.msk [vmem:[#allocation2] sm:$0xff] %vm2315_vm13, %v2331_v19 }
 0xe53   :  { %2975 = shalt.err (!%p2972_p4)
}
 0xe54   :  { %s2976_s10 = scalar_lea.hbm %s3828_s6, 128 }
 0xe55   :  { %p2977_p5 = scmp.ne.s32.totalorder %s3828_s6, %s2976_s10  ;;  %p2980_p6 = scmp.lt.u32.totalorder %s2976_s10, %s3828_s6 }
 0xe57   :  { %p2982_p7 = pnand %p2980_p6, %p2977_p5 }
 0xe59   :  { %2985 = shalt.err (!%p2982_p7)
}
 0xe5a   :  { %2342 = dma.vmem_to_hbm [thread:$0]  %s2340_s1, 128, %s3828_s6, [#allocation3]  }
 0xe5b   :  { %2986 = dma.done.wait [#allocation3], 128  }
 0xe5c   :  { %2987 = vsyncadd [#allocation3], 4294967168 }
 0xe5d   :  { %2346 = vsyncpa [#allocation3], 1 }

</bundles_post_ra>
